<compile_context>
chip_gen: v5e
topology: v5e:2x2
jax: 0.10.0
libtpu: 0.0.40
codegen_flags: <defaults>
</compile_context>

<pallas_src>
import numpy as np
import jax
import jax.numpy as jnp
from jax.experimental import pallas as pl
from jax.experimental.pallas import tpu as pltpu

EPS = 1e-5
B = 8                               # batch; layout assumes exactly 8
_VMEM_LIMIT = 32 * 1024 * 1024


# ------------------------------ Pallas kernel ------------------------------

def fused_branch_kernel(xcol_ref, cw_ref, sg_ref, rw_ref, wl_ref, d_ref):
    """One full CNN_AUX branch; grid axis 0 (size 2) selects the branch.

    Layouts (batch on sublanes everywhere, lane axis dense):
      xcol : (96, 42)   row = i*8 + b,  lane = ki*14 + j'     (conv1 im2col)
      y1   : (96, 256)  row = i*8 + b,  lane = 128*(j%2) + 16*(j//2) + c
                        (lanes 96:128 and 224:256 are zero pad)
      p1   : (48, 128)  row = hh*8 + b, lane = ww*16 + c      (lanes 96:128 pad)
      z2   : (32, 128)  row = h*8 + b,  lane = w*32 + co
      d    : (8, 10)    row = b,        lane = class
    """
    xcol = xcol_ref[0]                                       # (96, 42)

    # ---------------- Conv2d(1, 16, 3): one MXU matmul ----------------
    A = cw_ref[0, 0:42, :]                                   # Toeplitz conv1 weight
    b1t = cw_ref[0, 42:43, :]                                # (1, 256)
    y1 = jnp.dot(xcol, A, preferred_element_type=jnp.float32) + b1t   # (96, 256)

    # ------ BatchNorm2d(16), training-mode batch stats, single pass ------
    acc = y1[0:8, :]
    accsq = acc * acc
    for t in range(1, 12):                                   # static unroll, 12 row blocks
        blk = y1[8 * t:8 * t + 8, :]
        acc = acc + blk
        accsq = accsq + blk * blk
    s1 = jnp.sum(acc, axis=0, keepdims=True)                 # (1, 256)
    s2 = jnp.sum(accsq, axis=0, keepdims=True)               # (1, 256)
    stats = jnp.concatenate([s1, s2], axis=0)                # (2, 256)
    red = jnp.dot(stats, sg_ref[0], preferred_element_type=jnp.float32)  # (2, 16)
    cnt = float(96 * 12)                                     # N*H*W = 8*12*12
    mean = red[0:1, :] / cnt
    ex2 = red[1:2, :] / cnt
    var = jnp.maximum(ex2 - mean * mean, 0.0)                # clamp for safety
    inv = jax.lax.rsqrt(var + EPS)                           # (1, 16)
    # broadcast mean / 1/sigma back to the 256-lane layout with one tiny matmul
    mvb = jnp.dot(jnp.concatenate([mean, inv], axis=0), cw_ref[0, 48:64, :],
                  preferred_element_type=jnp.float32)        # (2, 256)
    scale = cw_ref[0, 43:44, :] * mvb[1:2, :]                # gamma * 1/sigma
    shift = cw_ref[0, 44:45, :] - mvb[0:1, :] * scale        # beta - mean*scale
    y1 = jnp.maximum(y1 * scale + shift, 0.0)                # BN + ReLU fused, one pass

    # ---------------- MaxPool2d(2, 2): 12x12 -> 6x6 ----------------
    pi = jnp.concatenate(
        [jnp.maximum(y1[16 * a:16 * a + 8, :], y1[16 * a + 8:16 * a + 16, :])
         for a in range(6)], axis=0)                         # pool over i (rows)
    p1 = jnp.maximum(pi[:, 0:128], pi[:, 128:256])           # pool over j (aligned halves)

    # -------- Conv2d(16, 32, 3): 3 MXU matmuls (one per kernel row ki) --------
    z2 = cw_ref[0, 45:46, 0:128]                             # conv2 bias (1, 128)
    for ki in range(3):
        z2 = z2 + jnp.dot(p1[8 * ki:8 * ki + 32, :],
                          rw_ref[0, 128 * ki:128 * ki + 128, :],
                          preferred_element_type=jnp.float32)          # (32, 128)

    # -------- MaxPool2d(2, 2): 4x4 -> 2x2, flatten, Linear(128, 10) --------
    zA = jnp.maximum(z2[0:8, :], z2[8:16, :])                # H = 0
    zB = jnp.maximum(z2[16:24, :], z2[24:32, :])             # H = 1
    pA = jnp.maximum(zA[:, 0:96], zA[:, 32:128])             # pool over w; valid @ [0:32),[64:96)
    pB = jnp.maximum(zB[:, 0:96], zB[:, 32:128])
    tail = wl_ref[0, 192:200, :]                             # rows: bias, bn gamma, bn beta
    z = (jnp.dot(pA, wl_ref[0, 0:96, :], preferred_element_type=jnp.float32)
         + jnp.dot(pB, wl_ref[0, 96:192, :], preferred_element_type=jnp.float32)
         + tail[0:1, :])                                     # (8, 10)

    # ---------------- BatchNorm1d(10) (batch stats) + Softmax ----------------
    m = jnp.mean(z, axis=0, keepdims=True)
    v = jnp.maximum(jnp.mean(z * z, axis=0, keepdims=True) - m * m, 0.0)
    z = (z - m) * jax.lax.rsqrt(v + EPS) * tail[1:2, :] + tail[2:3, :]
    z = z - jnp.max(z, axis=-1, keepdims=True)
    e = jnp.exp(z)
    d_ref[0] = e / jnp.sum(e, axis=-1, keepdims=True)        # exact softmax


# ------------------------------ model forward ------------------------------

def _prep_im2col(im):
    """torch `im.view(-1, 1, 14, 14)`, then per-output-row im2col -> (96, 42).

    Row = i*8 + b, column = ki*14 + j' (flat offset inside the 3-row window
    starting at image row i)."""
    x = im.reshape(-1, 14, 14)
    assert x.shape[0] == B, "kernel layout is specialized to batch == 8"
    rows = [x[:, i:i + 3, :].reshape(B, 42) for i in range(12)]
    return jnp.stack(rows, axis=0).reshape(12 * B, 42)


def cnn_aux_forward(im1, im2, params):
    xcol = jnp.stack([_prep_im2col(im1), _prep_im2col(im2)], axis=0)   # (2, 96, 42)

    d = pl.pallas_call(
        fused_branch_kernel,
        grid=(2,),
        in_specs=[
            pl.BlockSpec((1, 96, 42), lambda i: (i, 0, 0)),     # im2col image
            pl.BlockSpec((1, 64, 256), lambda i: (i, 0, 0)),    # conv1/BN slab
            pl.BlockSpec((1, 256, 16), lambda i: (i, 0, 0)),    # channel-sum matrix
            pl.BlockSpec((1, 384, 128), lambda i: (i, 0, 0)),   # conv2 weight (3 ki blocks)
            pl.BlockSpec((1, 200, 10), lambda i: (i, 0, 0)),    # linear/BN1d slab
        ],
        out_specs=pl.BlockSpec((1, B, 10), lambda i: (i, 0, 0)),
        out_shape=jax.ShapeDtypeStruct((2, B, 10), jnp.float32),
        compiler_params=pltpu.CompilerParams(
            dimension_semantics=("parallel",),      # 2 branches -> 2 TCs on v7x
            vmem_limit_bytes=_VMEM_LIMIT),
    )(xcol, params["cw"], params["sg"], params["rw"], params["wl"])

    d1, d2 = d[0], d[1]

    # Predictor head (needs both branches): tiny, so done in plain JAX.  This
    # removes the second pallas_call (v5e/v6e) and keeps the branch grid
    # "parallel" for the two v7x TensorCores.
    pp = params["pred"]
    z = jnp.concatenate([d1, d2], axis=1) @ pp["w"].T + pp["b"]
    m = jnp.mean(z, axis=0, keepdims=True)
    v = jnp.mean(jnp.square(z - m), axis=0, keepdims=True)
    z = (z - m) * jax.lax.rsqrt(v + EPS) * pp["g"] + pp["beta"]
    target = jax.nn.softmax(z, axis=1)
    return d1, d2, target


# ------------------------- parameter packing / init -------------------------

def _pack_branch(p):
    """Pack torch-layout branch weights into the kernel's lane-dense slabs."""
    conv1_w = np.asarray(p["conv1_w"]); conv1_b = np.asarray(p["conv1_b"])
    bn1_g = np.asarray(p["bn1_g"]); bn1_b = np.asarray(p["bn1_b"])
    conv2_w = np.asarray(p["conv2_w"]); conv2_b = np.asarray(p["conv2_b"])
    lin_w = np.asarray(p["lin_w"]); lin_b = np.asarray(p["lin_b"])
    bnl_g = np.asarray(p["bnl_g"]); bnl_b = np.asarray(p["bnl_b"])

    A = np.zeros((42, 256), np.float32)       # conv1 Toeplitz weight
    b1t = np.zeros((256,), np.float32)
    g1t = np.zeros((256,), np.float32)
    be1t = np.zeros((256,), np.float32)
    sgT = np.zeros((16, 256), np.float32)     # channel -> 256-lane broadcast matrix
    for par in range(2):                      # even-j half [0:128), odd-j half [128:256)
        for jj in range(6):
            j = 2 * jj + par
            base = 128 * par + 16 * jj
            for c in range(16):
                col = base + c
                b1t[col] = conv1_b[c]
                g1t[col] = bn1_g[c]
                be1t[col] = bn1_b[c]
                sgT[c, col] = 1.0
                for ki in range(3):
                    for kj in range(3):
                        A[ki * 14 + j + kj, col] = conv1_w[c, 0, ki, kj]

    b2t = np.zeros((128,), np.float32)
    rw = np.zeros((384, 128), np.float32)     # conv2: 3 stacked (128,128) blocks (per ki)
    for w in range(4):
        for co in range(32):
            col = 32 * w + co
            b2t[col] = conv2_b[co]
            for ki in range(3):
                for kj in range(3):
                    for ci in range(16):
                        rw[128 * ki + 16 * (w + kj) + ci, col] = conv2_w[co, ci, ki, kj]

    wl = np.zeros((200, 10), np.float32)      # Linear(128,10); torch flatten f = 4*co+2*H+W
    for co in range(32):
        wl[co, :] = lin_w[:, 4 * co + 0]          # H=0, W=0
        wl[64 + co, :] = lin_w[:, 4 * co + 1]     # H=0, W=1
        wl[96 + co, :] = lin_w[:, 4 * co + 2]     # H=1, W=0
        wl[160 + co, :] = lin_w[:, 4 * co + 3]    # H=1, W=1
    wl[192, :] = lin_b
    wl[193, :] = bnl_g
    wl[194, :] = bnl_b

    cw = np.zeros((64, 256), np.float32)
    cw[0:42] = A
    cw[42] = b1t
    cw[43] = g1t
    cw[44] = be1t
    cw[45, 0:128] = b2t
    cw[48:64] = sgT
    return dict(cw=cw, sg=sgT.T.copy(), rw=rw, wl=wl)


def init_params(key):
    ks = jax.random.split(key, 4)

    def branch_raw(k):
        kk = jax.random.split(k, 6)
        return dict(
            conv1_w=0.3 * jax.random.normal(kk[0], (16, 1, 3, 3), jnp.float32),
            conv1_b=0.1 * jax.random.normal(kk[1], (16,), jnp.float32),
            bn1_g=jnp.ones((16,), jnp.float32),
            bn1_b=jnp.zeros((16,), jnp.float32),
            conv2_w=0.1 * jax.random.normal(kk[2], (32, 16, 3, 3), jnp.float32),
            conv2_b=0.1 * jax.random.normal(kk[3], (32,), jnp.float32),
            lin_w=0.1 * jax.random.normal(kk[4], (10, 128), jnp.float32),
            lin_b=0.1 * jax.random.normal(kk[5], (10,), jnp.float32),
            bnl_g=jnp.ones((10,), jnp.float32),
            bnl_b=jnp.zeros((10,), jnp.float32))

    raw = (branch_raw(ks[0]), branch_raw(ks[1]))
    packed = [_pack_branch(r) for r in raw]
    params = dict(
        cw=jnp.stack([jnp.asarray(p["cw"]) for p in packed]),
        sg=jnp.stack([jnp.asarray(p["sg"]) for p in packed]),
        rw=jnp.stack([jnp.asarray(p["rw"]) for p in packed]),
        wl=jnp.stack([jnp.asarray(p["wl"]) for p in packed]),
        pred=dict(w=0.1 * jax.random.normal(ks[2], (2, 20), jnp.float32),
                  b=0.1 * jax.random.normal(ks[3], (2,), jnp.float32),
                  g=jnp.ones((2,), jnp.float32),
                  beta=jnp.zeros((2,), jnp.float32)))
    return params, raw


# --------------------------- plain-JAX reference ---------------------------

def _branch_ref(im, p):
    dn = ("NCHW", "OIHW", "NCHW")
    hi = jax.lax.Precision.HIGHEST
    x = im.reshape(-1, 1, 14, 14)
    y = jax.lax.conv_general_dilated(x, p["conv1_w"], (1, 1), "VALID",
                                     dimension_numbers=dn, precision=hi)
    y = y + p["conv1_b"][None, :, None, None]
    m = jnp.mean(y, axis=(0, 2, 3), keepdims=True)
    v = jnp.mean(jnp.square(y - m), axis=(0, 2, 3), keepdims=True)
    y = (y - m) * jax.lax.rsqrt(v + EPS)
    y = y * p["bn1_g"][None, :, None, None] + p["bn1_b"][None, :, None, None]
    y = jnp.maximum(y, 0.0)
    y = jax.lax.reduce_window(y, -jnp.inf, jax.lax.max, (1, 1, 2, 2), (1, 1, 2, 2), "VALID")
    y = jax.lax.conv_general_dilated(y, p["conv2_w"], (1, 1), "VALID",
                                     dimension_numbers=dn, precision=hi)
    y = y + p["conv2_b"][None, :, None, None]
    y = jax.lax.reduce_window(y, -jnp.inf, jax.lax.max, (1, 1, 2, 2), (1, 1, 2, 2), "VALID")
    f = y.reshape(y.shape[0], -1)
    z = jnp.dot(f, p["lin_w"].T, precision=hi) + p["lin_b"]
    m = jnp.mean(z, axis=0, keepdims=True)
    v = jnp.mean(jnp.square(z - m), axis=0, keepdims=True)
    z = (z - m) * jax.lax.rsqrt(v + EPS) * p["bnl_g"] + p["bnl_b"]
    return jax.nn.softmax(z, axis=1)


def _predictor_ref(d1, d2, pp):
    z = jnp.concatenate([d1, d2], axis=1) @ pp["w"].T + pp["b"]
    m = jnp.mean(z, axis=0, keepdims=True)
    v = jnp.mean(jnp.square(z - m), axis=0, keepdims=True)
    z = (z - m) * jax.lax.rsqrt(v + EPS) * pp["g"] + pp["beta"]
    return jax.nn.softmax(z, axis=1)


# ----------------------------------- main -----------------------------------

if __name__ == "__main__":
    key = jax.random.PRNGKey(0)
    kp, k1, k2 = jax.random.split(key, 3)
    params, raw = init_params(kp)

    im1 = jax.random.normal(k1, (B, 1, 14, 14), jnp.float32)
    im2 = jax.random.normal(k2, (B, 1, 14, 14), jnp.float32)

    d1, d2, target = jax.jit(cnn_aux_forward)(im1, im2, params)
    jax.block_until_ready((d1, d2, target))

    assert d1.shape == (B, 10) and d2.shape == (B, 10) and target.shape == (B, 2)
    assert bool(jnp.all(jnp.isfinite(d1)) & jnp.all(jnp.isfinite(d2))
                & jnp.all(jnp.isfinite(target)))
    assert jnp.allclose(jnp.sum(d1, axis=1), 1.0, atol=1e-4)
    assert jnp.allclose(jnp.sum(d2, axis=1), 1.0, atol=1e-4)
    assert jnp.allclose(jnp.sum(target, axis=1), 1.0, atol=1e-4)

    # cross-check against a plain-JAX reference of the torch module (only
    # matmul accumulation-order / MXU precision differences expected)
    r1 = _branch_ref(im1, raw[0])
    r2 = _branch_ref(im2, raw[1])
    rt = _predictor_ref(r1, r2, params["pred"])
    for got, ref in ((d1, r1), (d2, r2), (target, rt)):
        err = float(jnp.max(jnp.abs(got - ref)))
        assert err < 3e-2, f"mismatch vs reference: max abs err {err}"

    print("KERNEL_OK")
</pallas_src>

<mosaic_0001>
module attributes {stable_mosaic.version = 11 : i64} {
  func.func @fused_branch_kernel(%arg0: i32, %arg1: memref<1x96x42xf32, #tpu.memory_space<vmem>>, %arg2: memref<1x64x256xf32, #tpu.memory_space<vmem>>, %arg3: memref<1x256x16xf32, #tpu.memory_space<vmem>>, %arg4: memref<1x384x128xf32, #tpu.memory_space<vmem>>, %arg5: memref<1x200x10xf32, #tpu.memory_space<vmem>>, %arg6: memref<1x8x10xf32, #tpu.memory_space<vmem>>) attributes {dimension_semantics = [#tpu.dimension_semantics<parallel>], iteration_bounds = array<i64: 2>, scalar_prefetch = 0 : i64, scratch_operands = 0 : i64, tpu.core_type = #tpu.core_type<tc>, window_params = [{transform_indices = @transform_0, window_bounds = array<i64: 1, 96, 42>}, {transform_indices = @transform_1, window_bounds = array<i64: 1, 64, 256>}, {transform_indices = @transform_2, window_bounds = array<i64: 1, 256, 16>}, {transform_indices = @transform_3, window_bounds = array<i64: 1, 384, 128>}, {transform_indices = @transform_4, window_bounds = array<i64: 1, 200, 10>}, {transform_indices = @transform_5, window_bounds = array<i64: 1, 8, 10>}]} {
    %c0 = arith.constant 0 : index
    %c0_0 = arith.constant 0 : index
    %c0_1 = arith.constant 0 : index
    %0 = vector.load %arg1[%c0, %c0_0, %c0_1] : memref<1x96x42xf32, #tpu.memory_space<vmem>>, vector<1x96x42xf32>
    %1 = vector.shape_cast %0 : vector<1x96x42xf32> to vector<96x42xf32>
    %c0_2 = arith.constant 0 : index
    %c0_3 = arith.constant 0 : index
    %c0_4 = arith.constant 0 : index
    %2 = vector.load %arg2[%c0_2, %c0_3, %c0_4] : memref<1x64x256xf32, #tpu.memory_space<vmem>>, vector<1x42x256xf32>
    %3 = vector.shape_cast %2 : vector<1x42x256xf32> to vector<42x256xf32>
    %c0_5 = arith.constant 0 : index
    %c42 = arith.constant 42 : index
    %c0_6 = arith.constant 0 : index
    %4 = vector.load %arg2[%c0_5, %c42, %c0_6] : memref<1x64x256xf32, #tpu.memory_space<vmem>>, vector<1x1x256xf32>
    %5 = vector.shape_cast %4 : vector<1x1x256xf32> to vector<1x256xf32>
    %cst = arith.constant dense<0.000000e+00> : vector<96x256xf32>
    %6 = tpu.matmul %1, %3, %cst {dimension_numbers = #tpu.dot_dimension_numbers<[1], [0], [0], [1], [0, 0, 1, 1], [], []>} : vector<96x42xf32>, vector<42x256xf32>, vector<96x256xf32> -> vector<96x256xf32>
    %7 = vector.broadcast %5 : vector<1x256xf32> to vector<96x256xf32>
    %8 = arith.addf %6, %7 : vector<96x256xf32>
    %9 = vector.extract_strided_slice %8 {offsets = [0, 0], sizes = [8, 256], strides = [1, 1]} : vector<96x256xf32> to vector<8x256xf32>
    %10 = arith.mulf %9, %9 : vector<8x256xf32>
    %11 = vector.extract_strided_slice %8 {offsets = [8, 0], sizes = [8, 256], strides = [1, 1]} : vector<96x256xf32> to vector<8x256xf32>
    %12 = arith.addf %9, %11 : vector<8x256xf32>
    %13 = arith.mulf %11, %11 : vector<8x256xf32>
    %14 = arith.addf %10, %13 : vector<8x256xf32>
    %15 = vector.extract_strided_slice %8 {offsets = [16, 0], sizes = [8, 256], strides = [1, 1]} : vector<96x256xf32> to vector<8x256xf32>
    %16 = arith.addf %12, %15 : vector<8x256xf32>
    %17 = arith.mulf %15, %15 : vector<8x256xf32>
    %18 = arith.addf %14, %17 : vector<8x256xf32>
    %19 = vector.extract_strided_slice %8 {offsets = [24, 0], sizes = [8, 256], strides = [1, 1]} : vector<96x256xf32> to vector<8x256xf32>
    %20 = arith.addf %16, %19 : vector<8x256xf32>
    %21 = arith.mulf %19, %19 : vector<8x256xf32>
    %22 = arith.addf %18, %21 : vector<8x256xf32>
    %23 = vector.extract_strided_slice %8 {offsets = [32, 0], sizes = [8, 256], strides = [1, 1]} : vector<96x256xf32> to vector<8x256xf32>
    %24 = arith.addf %20, %23 : vector<8x256xf32>
    %25 = arith.mulf %23, %23 : vector<8x256xf32>
    %26 = arith.addf %22, %25 : vector<8x256xf32>
    %27 = vector.extract_strided_slice %8 {offsets = [40, 0], sizes = [8, 256], strides = [1, 1]} : vector<96x256xf32> to vector<8x256xf32>
    %28 = arith.addf %24, %27 : vector<8x256xf32>
    %29 = arith.mulf %27, %27 : vector<8x256xf32>
    %30 = arith.addf %26, %29 : vector<8x256xf32>
    %31 = vector.extract_strided_slice %8 {offsets = [48, 0], sizes = [8, 256], strides = [1, 1]} : vector<96x256xf32> to vector<8x256xf32>
    %32 = arith.addf %28, %31 : vector<8x256xf32>
    %33 = arith.mulf %31, %31 : vector<8x256xf32>
    %34 = arith.addf %30, %33 : vector<8x256xf32>
    %35 = vector.extract_strided_slice %8 {offsets = [56, 0], sizes = [8, 256], strides = [1, 1]} : vector<96x256xf32> to vector<8x256xf32>
    %36 = arith.addf %32, %35 : vector<8x256xf32>
    %37 = arith.mulf %35, %35 : vector<8x256xf32>
    %38 = arith.addf %34, %37 : vector<8x256xf32>
    %39 = vector.extract_strided_slice %8 {offsets = [64, 0], sizes = [8, 256], strides = [1, 1]} : vector<96x256xf32> to vector<8x256xf32>
    %40 = arith.addf %36, %39 : vector<8x256xf32>
    %41 = arith.mulf %39, %39 : vector<8x256xf32>
    %42 = arith.addf %38, %41 : vector<8x256xf32>
    %43 = vector.extract_strided_slice %8 {offsets = [72, 0], sizes = [8, 256], strides = [1, 1]} : vector<96x256xf32> to vector<8x256xf32>
    %44 = arith.addf %40, %43 : vector<8x256xf32>
    %45 = arith.mulf %43, %43 : vector<8x256xf32>
    %46 = arith.addf %42, %45 : vector<8x256xf32>
    %47 = vector.extract_strided_slice %8 {offsets = [80, 0], sizes = [8, 256], strides = [1, 1]} : vector<96x256xf32> to vector<8x256xf32>
    %48 = arith.addf %44, %47 : vector<8x256xf32>
    %49 = arith.mulf %47, %47 : vector<8x256xf32>
    %50 = arith.addf %46, %49 : vector<8x256xf32>
    %51 = vector.extract_strided_slice %8 {offsets = [88, 0], sizes = [8, 256], strides = [1, 1]} : vector<96x256xf32> to vector<8x256xf32>
    %52 = arith.addf %48, %51 : vector<8x256xf32>
    %53 = arith.mulf %51, %51 : vector<8x256xf32>
    %54 = arith.addf %50, %53 : vector<8x256xf32>
    %cst_7 = arith.constant dense<0.000000e+00> : vector<256xf32>
    %55 = vector.multi_reduction <add>, %52, %cst_7 [0] : vector<8x256xf32> to vector<256xf32>
    %56 = vector.shape_cast %55 : vector<256xf32> to vector<1x256xf32>
    %cst_8 = arith.constant dense<0.000000e+00> : vector<256xf32>
    %57 = vector.multi_reduction <add>, %54, %cst_8 [0] : vector<8x256xf32> to vector<256xf32>
    %58 = vector.shape_cast %57 : vector<256xf32> to vector<1x256xf32>
    %59 = tpu.concatenate %56, %58 in 0 : vector<1x256xf32>, vector<1x256xf32> -> vector<2x256xf32>
    %c0_9 = arith.constant 0 : index
    %c0_10 = arith.constant 0 : index
    %c0_11 = arith.constant 0 : index
    %60 = vector.load %arg3[%c0_9, %c0_10, %c0_11] : memref<1x256x16xf32, #tpu.memory_space<vmem>>, vector<1x256x16xf32>
    %61 = vector.shape_cast %60 : vector<1x256x16xf32> to vector<256x16xf32>
    %cst_12 = arith.constant dense<0.000000e+00> : vector<2x16xf32>
    %62 = tpu.matmul %59, %61, %cst_12 {dimension_numbers = #tpu.dot_dimension_numbers<[1], [0], [0], [1], [0, 0, 1, 1], [], []>} : vector<2x256xf32>, vector<256x16xf32>, vector<2x16xf32> -> vector<2x16xf32>
    %63 = vector.extract_strided_slice %62 {offsets = [0, 0], sizes = [1, 16], strides = [1, 1]} : vector<2x16xf32> to vector<1x16xf32>
    %cst_13 = arith.constant 1.152000e+03 : f32
    %64 = vector.broadcast %cst_13 : f32 to vector<1x16xf32>
    %65 = arith.divf %63, %64 : vector<1x16xf32>
    %66 = vector.extract_strided_slice %62 {offsets = [1, 0], sizes = [1, 16], strides = [1, 1]} : vector<2x16xf32> to vector<1x16xf32>
    %cst_14 = arith.constant 1.152000e+03 : f32
    %67 = vector.broadcast %cst_14 : f32 to vector<1x16xf32>
    %68 = arith.divf %66, %67 : vector<1x16xf32>
    %69 = arith.mulf %65, %65 : vector<1x16xf32>
    %70 = arith.subf %68, %69 : vector<1x16xf32>
    %cst_15 = arith.constant 0.000000e+00 : f32
    %71 = vector.broadcast %cst_15 : f32 to vector<1x16xf32>
    %72 = arith.maximumf %70, %71 : vector<1x16xf32>
    %cst_16 = arith.constant 9.99999974E-6 : f32
    %73 = vector.broadcast %cst_16 : f32 to vector<1x16xf32>
    %74 = arith.addf %72, %73 : vector<1x16xf32>
    %75 = math.rsqrt %74 : vector<1x16xf32>
    %76 = tpu.concatenate %65, %75 in 0 : vector<1x16xf32>, vector<1x16xf32> -> vector<2x16xf32>
    %c0_17 = arith.constant 0 : index
    %c48 = arith.constant 48 : index
    %c0_18 = arith.constant 0 : index
    %77 = vector.load %arg2[%c0_17, %c48, %c0_18] : memref<1x64x256xf32, #tpu.memory_space<vmem>>, vector<1x16x256xf32>
    %78 = vector.shape_cast %77 : vector<1x16x256xf32> to vector<16x256xf32>
    %cst_19 = arith.constant dense<0.000000e+00> : vector<2x256xf32>
    %79 = tpu.matmul %76, %78, %cst_19 {dimension_numbers = #tpu.dot_dimension_numbers<[1], [0], [0], [1], [0, 0, 1, 1], [], []>} : vector<2x16xf32>, vector<16x256xf32>, vector<2x256xf32> -> vector<2x256xf32>
    %c0_20 = arith.constant 0 : index
    %c43 = arith.constant 43 : index
    %c0_21 = arith.constant 0 : index
    %80 = vector.load %arg2[%c0_20, %c43, %c0_21] : memref<1x64x256xf32, #tpu.memory_space<vmem>>, vector<1x1x256xf32>
    %81 = vector.shape_cast %80 : vector<1x1x256xf32> to vector<1x256xf32>
    %82 = vector.extract_strided_slice %79 {offsets = [1, 0], sizes = [1, 256], strides = [1, 1]} : vector<2x256xf32> to vector<1x256xf32>
    %83 = arith.mulf %81, %82 : vector<1x256xf32>
    %c0_22 = arith.constant 0 : index
    %c44 = arith.constant 44 : index
    %c0_23 = arith.constant 0 : index
    %84 = vector.load %arg2[%c0_22, %c44, %c0_23] : memref<1x64x256xf32, #tpu.memory_space<vmem>>, vector<1x1x256xf32>
    %85 = vector.shape_cast %84 : vector<1x1x256xf32> to vector<1x256xf32>
    %86 = vector.extract_strided_slice %79 {offsets = [0, 0], sizes = [1, 256], strides = [1, 1]} : vector<2x256xf32> to vector<1x256xf32>
    %87 = arith.mulf %86, %83 : vector<1x256xf32>
    %88 = arith.subf %85, %87 : vector<1x256xf32>
    %89 = vector.broadcast %83 : vector<1x256xf32> to vector<96x256xf32>
    %90 = arith.mulf %8, %89 : vector<96x256xf32>
    %91 = vector.broadcast %88 : vector<1x256xf32> to vector<96x256xf32>
    %92 = arith.addf %90, %91 : vector<96x256xf32>
    %cst_24 = arith.constant 0.000000e+00 : f32
    %93 = vector.broadcast %cst_24 : f32 to vector<96x256xf32>
    %94 = arith.maximumf %92, %93 : vector<96x256xf32>
    %95 = vector.extract_strided_slice %94 {offsets = [0, 0], sizes = [8, 256], strides = [1, 1]} : vector<96x256xf32> to vector<8x256xf32>
    %96 = vector.extract_strided_slice %94 {offsets = [8, 0], sizes = [8, 256], strides = [1, 1]} : vector<96x256xf32> to vector<8x256xf32>
    %97 = arith.maximumf %95, %96 : vector<8x256xf32>
    %98 = vector.extract_strided_slice %94 {offsets = [16, 0], sizes = [8, 256], strides = [1, 1]} : vector<96x256xf32> to vector<8x256xf32>
    %99 = vector.extract_strided_slice %94 {offsets = [24, 0], sizes = [8, 256], strides = [1, 1]} : vector<96x256xf32> to vector<8x256xf32>
    %100 = arith.maximumf %98, %99 : vector<8x256xf32>
    %101 = vector.extract_strided_slice %94 {offsets = [32, 0], sizes = [8, 256], strides = [1, 1]} : vector<96x256xf32> to vector<8x256xf32>
    %102 = vector.extract_strided_slice %94 {offsets = [40, 0], sizes = [8, 256], strides = [1, 1]} : vector<96x256xf32> to vector<8x256xf32>
    %103 = arith.maximumf %101, %102 : vector<8x256xf32>
    %104 = vector.extract_strided_slice %94 {offsets = [48, 0], sizes = [8, 256], strides = [1, 1]} : vector<96x256xf32> to vector<8x256xf32>
    %105 = vector.extract_strided_slice %94 {offsets = [56, 0], sizes = [8, 256], strides = [1, 1]} : vector<96x256xf32> to vector<8x256xf32>
    %106 = arith.maximumf %104, %105 : vector<8x256xf32>
    %107 = vector.extract_strided_slice %94 {offsets = [64, 0], sizes = [8, 256], strides = [1, 1]} : vector<96x256xf32> to vector<8x256xf32>
    %108 = vector.extract_strided_slice %94 {offsets = [72, 0], sizes = [8, 256], strides = [1, 1]} : vector<96x256xf32> to vector<8x256xf32>
    %109 = arith.maximumf %107, %108 : vector<8x256xf32>
    %110 = vector.extract_strided_slice %94 {offsets = [80, 0], sizes = [8, 256], strides = [1, 1]} : vector<96x256xf32> to vector<8x256xf32>
    %111 = vector.extract_strided_slice %94 {offsets = [88, 0], sizes = [8, 256], strides = [1, 1]} : vector<96x256xf32> to vector<8x256xf32>
    %112 = arith.maximumf %110, %111 : vector<8x256xf32>
    %113 = tpu.concatenate %97, %100, %103, %106, %109, %112 in 0 : vector<8x256xf32>, vector<8x256xf32>, vector<8x256xf32>, vector<8x256xf32>, vector<8x256xf32>, vector<8x256xf32> -> vector<48x256xf32>
    %114 = vector.extract_strided_slice %113 {offsets = [0, 0], sizes = [48, 128], strides = [1, 1]} : vector<48x256xf32> to vector<48x128xf32>
    %115 = vector.extract_strided_slice %113 {offsets = [0, 128], sizes = [48, 128], strides = [1, 1]} : vector<48x256xf32> to vector<48x128xf32>
    %116 = arith.maximumf %114, %115 : vector<48x128xf32>
    %c0_25 = arith.constant 0 : index
    %c45 = arith.constant 45 : index
    %c0_26 = arith.constant 0 : index
    %117 = vector.load %arg2[%c0_25, %c45, %c0_26] : memref<1x64x256xf32, #tpu.memory_space<vmem>>, vector<1x1x128xf32>
    %118 = vector.shape_cast %117 : vector<1x1x128xf32> to vector<1x128xf32>
    %119 = vector.extract_strided_slice %116 {offsets = [0, 0], sizes = [32, 128], strides = [1, 1]} : vector<48x128xf32> to vector<32x128xf32>
    %c0_27 = arith.constant 0 : index
    %c0_28 = arith.constant 0 : index
    %c0_29 = arith.constant 0 : index
    %120 = vector.load %arg4[%c0_27, %c0_28, %c0_29] : memref<1x384x128xf32, #tpu.memory_space<vmem>>, vector<1x128x128xf32>
    %121 = vector.shape_cast %120 : vector<1x128x128xf32> to vector<128x128xf32>
    %cst_30 = arith.constant dense<0.000000e+00> : vector<32x128xf32>
    %122 = tpu.matmul %119, %121, %cst_30 {dimension_numbers = #tpu.dot_dimension_numbers<[1], [0], [0], [1], [0, 0, 1, 1], [], []>} : vector<32x128xf32>, vector<128x128xf32>, vector<32x128xf32> -> vector<32x128xf32>
    %123 = vector.broadcast %118 : vector<1x128xf32> to vector<32x128xf32>
    %124 = arith.addf %123, %122 : vector<32x128xf32>
    %125 = vector.extract_strided_slice %116 {offsets = [8, 0], sizes = [32, 128], strides = [1, 1]} : vector<48x128xf32> to vector<32x128xf32>
    %c0_31 = arith.constant 0 : index
    %c128 = arith.constant 128 : index
    %c0_32 = arith.constant 0 : index
    %126 = vector.load %arg4[%c0_31, %c128, %c0_32] : memref<1x384x128xf32, #tpu.memory_space<vmem>>, vector<1x128x128xf32>
    %127 = vector.shape_cast %126 : vector<1x128x128xf32> to vector<128x128xf32>
    %cst_33 = arith.constant dense<0.000000e+00> : vector<32x128xf32>
    %128 = tpu.matmul %125, %127, %cst_33 {dimension_numbers = #tpu.dot_dimension_numbers<[1], [0], [0], [1], [0, 0, 1, 1], [], []>} : vector<32x128xf32>, vector<128x128xf32>, vector<32x128xf32> -> vector<32x128xf32>
    %129 = arith.addf %124, %128 : vector<32x128xf32>
    %130 = vector.extract_strided_slice %116 {offsets = [16, 0], sizes = [32, 128], strides = [1, 1]} : vector<48x128xf32> to vector<32x128xf32>
    %c0_34 = arith.constant 0 : index
    %c256 = arith.constant 256 : index
    %c0_35 = arith.constant 0 : index
    %131 = vector.load %arg4[%c0_34, %c256, %c0_35] : memref<1x384x128xf32, #tpu.memory_space<vmem>>, vector<1x128x128xf32>
    %132 = vector.shape_cast %131 : vector<1x128x128xf32> to vector<128x128xf32>
    %cst_36 = arith.constant dense<0.000000e+00> : vector<32x128xf32>
    %133 = tpu.matmul %130, %132, %cst_36 {dimension_numbers = #tpu.dot_dimension_numbers<[1], [0], [0], [1], [0, 0, 1, 1], [], []>} : vector<32x128xf32>, vector<128x128xf32>, vector<32x128xf32> -> vector<32x128xf32>
    %134 = arith.addf %129, %133 : vector<32x128xf32>
    %135 = vector.extract_strided_slice %134 {offsets = [0, 0], sizes = [8, 128], strides = [1, 1]} : vector<32x128xf32> to vector<8x128xf32>
    %136 = vector.extract_strided_slice %134 {offsets = [8, 0], sizes = [8, 128], strides = [1, 1]} : vector<32x128xf32> to vector<8x128xf32>
    %137 = arith.maximumf %135, %136 : vector<8x128xf32>
    %138 = vector.extract_strided_slice %134 {offsets = [16, 0], sizes = [8, 128], strides = [1, 1]} : vector<32x128xf32> to vector<8x128xf32>
    %139 = vector.extract_strided_slice %134 {offsets = [24, 0], sizes = [8, 128], strides = [1, 1]} : vector<32x128xf32> to vector<8x128xf32>
    %140 = arith.maximumf %138, %139 : vector<8x128xf32>
    %141 = vector.extract_strided_slice %137 {offsets = [0, 0], sizes = [8, 96], strides = [1, 1]} : vector<8x128xf32> to vector<8x96xf32>
    %142 = vector.extract_strided_slice %137 {offsets = [0, 32], sizes = [8, 96], strides = [1, 1]} : vector<8x128xf32> to vector<8x96xf32>
    %143 = arith.maximumf %141, %142 : vector<8x96xf32>
    %144 = vector.extract_strided_slice %140 {offsets = [0, 0], sizes = [8, 96], strides = [1, 1]} : vector<8x128xf32> to vector<8x96xf32>
    %145 = vector.extract_strided_slice %140 {offsets = [0, 32], sizes = [8, 96], strides = [1, 1]} : vector<8x128xf32> to vector<8x96xf32>
    %146 = arith.maximumf %144, %145 : vector<8x96xf32>
    %c0_37 = arith.constant 0 : index
    %c192 = arith.constant 192 : index
    %c0_38 = arith.constant 0 : index
    %147 = vector.load %arg5[%c0_37, %c192, %c0_38] : memref<1x200x10xf32, #tpu.memory_space<vmem>>, vector<1x8x10xf32>
    %148 = vector.shape_cast %147 : vector<1x8x10xf32> to vector<8x10xf32>
    %c0_39 = arith.constant 0 : index
    %c0_40 = arith.constant 0 : index
    %c0_41 = arith.constant 0 : index
    %149 = vector.load %arg5[%c0_39, %c0_40, %c0_41] : memref<1x200x10xf32, #tpu.memory_space<vmem>>, vector<1x96x10xf32>
    %150 = vector.shape_cast %149 : vector<1x96x10xf32> to vector<96x10xf32>
    %cst_42 = arith.constant dense<0.000000e+00> : vector<8x10xf32>
    %151 = tpu.matmul %143, %150, %cst_42 {dimension_numbers = #tpu.dot_dimension_numbers<[1], [0], [0], [1], [0, 0, 1, 1], [], []>} : vector<8x96xf32>, vector<96x10xf32>, vector<8x10xf32> -> vector<8x10xf32>
    %c0_43 = arith.constant 0 : index
    %c96 = arith.constant 96 : index
    %c0_44 = arith.constant 0 : index
    %152 = vector.load %arg5[%c0_43, %c96, %c0_44] : memref<1x200x10xf32, #tpu.memory_space<vmem>>, vector<1x96x10xf32>
    %153 = vector.shape_cast %152 : vector<1x96x10xf32> to vector<96x10xf32>
    %cst_45 = arith.constant dense<0.000000e+00> : vector<8x10xf32>
    %154 = tpu.matmul %146, %153, %cst_45 {dimension_numbers = #tpu.dot_dimension_numbers<[1], [0], [0], [1], [0, 0, 1, 1], [], []>} : vector<8x96xf32>, vector<96x10xf32>, vector<8x10xf32> -> vector<8x10xf32>
    %155 = arith.addf %151, %154 : vector<8x10xf32>
    %156 = vector.extract_strided_slice %148 {offsets = [0, 0], sizes = [1, 10], strides = [1, 1]} : vector<8x10xf32> to vector<1x10xf32>
    %157 = vector.broadcast %156 : vector<1x10xf32> to vector<8x10xf32>
    %158 = arith.addf %155, %157 : vector<8x10xf32>
    %cst_46 = arith.constant dense<0.000000e+00> : vector<10xf32>
    %159 = vector.multi_reduction <add>, %158, %cst_46 [0] : vector<8x10xf32> to vector<10xf32>
    %160 = vector.shape_cast %159 : vector<10xf32> to vector<1x10xf32>
    %cst_47 = arith.constant 8.000000e+00 : f32
    %161 = vector.broadcast %cst_47 : f32 to vector<1x10xf32>
    %162 = arith.divf %160, %161 : vector<1x10xf32>
    %163 = arith.mulf %158, %158 : vector<8x10xf32>
    %cst_48 = arith.constant dense<0.000000e+00> : vector<10xf32>
    %164 = vector.multi_reduction <add>, %163, %cst_48 [0] : vector<8x10xf32> to vector<10xf32>
    %165 = vector.shape_cast %164 : vector<10xf32> to vector<1x10xf32>
    %cst_49 = arith.constant 8.000000e+00 : f32
    %166 = vector.broadcast %cst_49 : f32 to vector<1x10xf32>
    %167 = arith.divf %165, %166 : vector<1x10xf32>
    %168 = arith.mulf %162, %162 : vector<1x10xf32>
    %169 = arith.subf %167, %168 : vector<1x10xf32>
    %cst_50 = arith.constant 0.000000e+00 : f32
    %170 = vector.broadcast %cst_50 : f32 to vector<1x10xf32>
    %171 = arith.maximumf %169, %170 : vector<1x10xf32>
    %172 = vector.broadcast %162 : vector<1x10xf32> to vector<8x10xf32>
    %173 = arith.subf %158, %172 : vector<8x10xf32>
    %cst_51 = arith.constant 9.99999974E-6 : f32
    %174 = vector.broadcast %cst_51 : f32 to vector<1x10xf32>
    %175 = arith.addf %171, %174 : vector<1x10xf32>
    %176 = math.rsqrt %175 : vector<1x10xf32>
    %177 = vector.broadcast %176 : vector<1x10xf32> to vector<8x10xf32>
    %178 = arith.mulf %173, %177 : vector<8x10xf32>
    %179 = vector.extract_strided_slice %148 {offsets = [1, 0], sizes = [1, 10], strides = [1, 1]} : vector<8x10xf32> to vector<1x10xf32>
    %180 = vector.broadcast %179 : vector<1x10xf32> to vector<8x10xf32>
    %181 = arith.mulf %178, %180 : vector<8x10xf32>
    %182 = vector.extract_strided_slice %148 {offsets = [2, 0], sizes = [1, 10], strides = [1, 1]} : vector<8x10xf32> to vector<1x10xf32>
    %183 = vector.broadcast %182 : vector<1x10xf32> to vector<8x10xf32>
    %184 = arith.addf %181, %183 : vector<8x10xf32>
    %cst_52 = arith.constant dense<0xFF800000> : vector<8xf32>
    %185 = vector.multi_reduction <maximumf>, %184, %cst_52 [1] : vector<8x10xf32> to vector<8xf32>
    %186 = vector.shape_cast %185 : vector<8xf32> to vector<8x1xf32>
    %187 = vector.broadcast %186 : vector<8x1xf32> to vector<8x10xf32>
    %188 = arith.subf %184, %187 : vector<8x10xf32>
    %189 = math.exp %188 : vector<8x10xf32>
    %cst_53 = arith.constant dense<0.000000e+00> : vector<8xf32>
    %190 = vector.multi_reduction <add>, %189, %cst_53 [1] : vector<8x10xf32> to vector<8xf32>
    %191 = vector.shape_cast %190 : vector<8xf32> to vector<8x1xf32>
    %192 = vector.broadcast %191 : vector<8x1xf32> to vector<8x10xf32>
    %193 = arith.divf %189, %192 : vector<8x10xf32>
    %c0_54 = arith.constant 0 : index
    %c0_55 = arith.constant 0 : index
    %c0_56 = arith.constant 0 : index
    %194 = vector.load %arg6[%c0_54, %c0_55, %c0_56] : memref<1x8x10xf32, #tpu.memory_space<vmem>>, vector<1x8x10xf32>
    %195 = vector.shape_cast %194 : vector<1x8x10xf32> to vector<8x10xf32>
    %196 = vector.shape_cast %193 : vector<8x10xf32> to vector<1x8x10xf32>
    tpu.vector_store %arg6[%c0_54, %c0_55, %c0_56], %196 {strides = array<i32>} : memref<1x8x10xf32, #tpu.memory_space<vmem>>, vector<1x8x10xf32>,
    return
  }
  func.func @transform_0(%arg0: i32) -> (i32, i32, i32) {
    %c0_i32 = arith.constant 0 : i32
    %c0_i32_0 = arith.constant 0 : i32
    %c0_i32_1 = arith.constant 0 : i32
    return %arg0, %c0_i32, %c0_i32_0 : i32, i32, i32
  }
  func.func @transform_1(%arg0: i32) -> (i32, i32, i32) {
    %c0_i32 = arith.constant 0 : i32
    %c0_i32_0 = arith.constant 0 : i32
    %c0_i32_1 = arith.constant 0 : i32
    return %arg0, %c0_i32, %c0_i32_0 : i32, i32, i32
  }
  func.func @transform_2(%arg0: i32) -> (i32, i32, i32) {
    %c0_i32 = arith.constant 0 : i32
    %c0_i32_0 = arith.constant 0 : i32
    %c0_i32_1 = arith.constant 0 : i32
    return %arg0, %c0_i32, %c0_i32_0 : i32, i32, i32
  }
  func.func @transform_3(%arg0: i32) -> (i32, i32, i32) {
    %c0_i32 = arith.constant 0 : i32
    %c0_i32_0 = arith.constant 0 : i32
    %c0_i32_1 = arith.constant 0 : i32
    return %arg0, %c0_i32, %c0_i32_0 : i32, i32, i32
  }
  func.func @transform_4(%arg0: i32) -> (i32, i32, i32) {
    %c0_i32 = arith.constant 0 : i32
    %c0_i32_0 = arith.constant 0 : i32
    %c0_i32_1 = arith.constant 0 : i32
    return %arg0, %c0_i32, %c0_i32_0 : i32, i32, i32
  }
  func.func @transform_5(%arg0: i32) -> (i32, i32, i32) {
    %c0_i32 = arith.constant 0 : i32
    %c0_i32_0 = arith.constant 0 : i32
    %c0_i32_1 = arith.constant 0 : i32
    return %arg0, %c0_i32, %c0_i32_0 : i32, i32, i32
  }
}

</mosaic_0001>

<bundles_post_ra>
// kernel: cnn_aux_forward.1
= control target key start
LH: loop header
LB: loop body
LE: loop exit
PB: predicated region body
PF: predicated region fallthrough
CT: control target
= control target key end

     0   :  { %s1367_s18 = smov 0   ;;  %s1844_s0 = inlined_call_operand.vmem [shape: f32[2,96,42], index: 0, kind: input, shape index: {}]   ;;  %s1845_s1 = inlined_call_operand.vmem [shape: f32[2,64,256], index: 1, kind: input, shape index: {}]   ;;  %s1846_s2 = inlined_call_operand.vmem [shape: f32[2,256,16], index: 2, kind: input, shape index: {}]   ;;  %s1847_s3 = inlined_call_operand.vmem [shape: f32[2,384,128], index: 3, kind: input, shape index: {}]   ;;  %s1848_s4 = inlined_call_operand.vmem [shape: f32[2,200,10], index: 4, kind: input, shape index: {}]   ;;  %s1849_s5 = inlined_call_operand.vmem [shape: f32[2,8,10], index: 5, kind: output, shape index: {}]  }
   0x1 LB: > { %s1250_s19 = sadd.s32 4294967295, %s1332_s18   ;;  %p1254_p0 = scmp.ge.s32.totalorder %s1332_s18, 1  ;;  %s1332_s18 = sphi %s1367_s18, %s15_s18  }
   0x2   : > { %p227_p1 = scmp.lt.s32.totalorder %s1332_s18, 3 }
   0x4   : > { %p228_p2 = pnand %p1254_p0, %p227_p1 }
   0x5   : > { %p274_p3 = scmp.lt.s32.totalorder (!%p228_p2), %s1250_s19, 1  ;;  %s1335_s15 = smov (!%p228_p2), 96  }
   0x6   : > { %231 = sbr.rel (%p228_p2) target bundleno = 1343 (0x53f), region = 40 }
   0xb   : > { %s1851_s19 = smov (!%p274_p3, %s1250_s19), 1  ;;  %vm371_vm0 = vcmask 1041408   ;;  %vm334_vm1 = vcmask 343040   ;;  %vm576_vm2 = vcmask 1040384   ;;  %vm681_vm7 = vcmask 130048  }
   0xc   : > { %s1298_s20 = sshll.u32 %s1851_s19, 7  ;;  %s1300_s24 = smul.u32 96, %s1851_s19  ;;  %vm1030_vm8 = vcmask 785408   ;;  %vm1079_vm9 = vcmask 80896  }
   0xd   : > { %s1381_s23 = scalar_lea.vmem %s1845_s1, %s1298_s20  ;;  %s1299_s28 = sshll.u32 %s1851_s19, 8 }
   0xe   : > { %v325_v0 = vld [vmem:[%s1381_s23 + $0x50] sm:$0x3]  ;;  %v326_v1 = vld [vmem:[%s1381_s23 + $0x58] sm:$0x3]  ;;  %v323_v2 = vld [vmem:[%s1381_s23 + $0x40] sm:$0xff]  ;;  %s1397_s27 = scalar_lea.vmem %s1844_s0, %s1300_s24  ;;  %s1441_s6 = scalar_lea.vmem %s1846_s2, %s1299_s28 }
   0xf   : > { %1264 = vmatpush.msk.msra.mxu0 %vm371_vm0, %v325_v0  ;;  %1277 = vmatpush.msk.msra.mxu1 %vm371_vm0, %v326_v1  ;;  %v324_v3 = vld [vmem:[%s1381_s23 + $0x48] sm:$0xff]  ;;  %v321_v4 = vld [vmem:[%s1381_s23 + $0x30] sm:$0xff]  ;;  %v322_v5 = vld [vmem:[%s1381_s23 + $0x38] sm:$0xff]  ;;  %s1301_s7 = smul.u32 384, %s1851_s19  ;;  %s1262_s16 = sshll.u32 %s1851_s19, 3 }
  0x10   : > { %v319_v6 = vld [vmem:[%s1381_s23 + $0x20] sm:$0xff]  ;;  %v320_v7 = vld [vmem:[%s1381_s23 + $0x28] sm:$0xff]  ;;  %v317_v8 = vld [vmem:[%s1381_s23 + $0x10] sm:$0xff]  ;;  %s1302_s11 = smul.u32 200, %s1851_s19  ;;  %s302_s21 = scalar_lea.vmem %s1849_s5, %s1262_s16 }
  0x11   : > { %389 = vmatpush.msra.mxu0 %v323_v2  ;;  %442 = vmatpush.msra.mxu1 %v324_v3  ;;  %v318_v9 = vld [vmem:[%s1381_s23 + $0x18] sm:$0xff]  ;;  %v315_v10 = vld [vmem:[%s1381_s23] sm:$0xff]  ;;  %v316_v11 = vld [vmem:[%s1381_s23 + $0x8] sm:$0xff]  ;;  %s1664_s10 = scalar_lea.vmem %s1847_s3, %s1301_s7 }
  0x12   : > { %v303_v12 = vld [vmem:[%s1397_s27] sm:$0xff]  ;;  %v304_v13 = vld [vmem:[%s1397_s27 + $0x8] sm:$0xff]  ;;  %v305_v14 = vld [vmem:[%s1397_s27 + $0x10] sm:$0xff]  ;;  %s1804_s14 = scalar_lea.vmem %s1848_s4, %s1302_s11 }
  0x13   : > { %390 = vmatpush.msra.mxu0 %v321_v4  ;;  %443 = vmatpush.msra.mxu1 %v322_v5  ;;  %v306_v15 = vld [vmem:[%s1397_s27 + $0x18] sm:$0xff]  ;;  %v307_v16 = vld [vmem:[%s1397_s27 + $0x20] sm:$0xff]  ;;  %v308_v17 = vld [vmem:[%s1397_s27 + $0x28] sm:$0xff] }
  0x14   : > { %v309_v18 = vld [vmem:[%s1397_s27 + $0x30] sm:$0xff]  ;;  %v310_v19 = vld [vmem:[%s1397_s27 + $0x38] sm:$0xff]  ;;  %v311_v20 = vld [vmem:[%s1397_s27 + $0x40] sm:$0xff] }
  0x15   : > { %391 = vmatpush.msra.mxu0 %v319_v6  ;;  %444 = vmatpush.msra.mxu1 %v320_v7  ;;  %v312_v21 = vld [vmem:[%s1397_s27 + $0x48] sm:$0xff]  ;;  %v313_v22 = vld [vmem:[%s1397_s27 + $0x50] sm:$0xff]  ;;  %v314_v23 = vld [vmem:[%s1397_s27 + $0x58] sm:$0xff] }
  0x16   : > { %v594_v24 = vld [vmem:[%s1441_s6 + $0x78] sm:$0xff]  ;;  %v593_v25 = vld [vmem:[%s1441_s6 + $0x70] sm:$0xff]  ;;  %v592_v26 = vld [vmem:[%s1441_s6 + $0x68] sm:$0xff] }
  0x17   : > { %392 = vmatpush.msra.mxu0 %v317_v8  ;;  %445 = vmatpush.msra.mxu1 %v318_v9  ;;  %v591_v29 = vld [vmem:[%s1441_s6 + $0x60] sm:$0xff]  ;;  %v590_v32 = vld [vmem:[%s1441_s6 + $0x58] sm:$0xff]  ;;  %v589_v35 = vld [vmem:[%s1441_s6 + $0x50] sm:$0xff] }
  0x18   : > { %v588_v36 = vld [vmem:[%s1441_s6 + $0x48] sm:$0xff]  ;;  %v587_v39 = vld [vmem:[%s1441_s6 + $0x40] sm:$0xff]  ;;  %v586_v42 = vld [vmem:[%s1441_s6 + $0x38] sm:$0xff] }
  0x19   : > { %393 = vmatpush.msra.mxu0 %v315_v10  ;;  %446 = vmatpush.msra.mxu1 %v316_v11  ;;  %v610_v45 = vld [vmem:[%s1441_s6 + $0xf8] sm:$0xff]  ;;  %v585_v46 = vld [vmem:[%s1441_s6 + $0x30] sm:$0xff]  ;;  %v584_v47 = vld [vmem:[%s1441_s6 + $0x28] sm:$0xff] }
  0x1a   : > { %1265 = vmatmul.msk.f32.vlgmr.msra.gmra.mxu0 %vm334_vm1, %v303_v12  ;;  %1278 = vmatmul.msk.f32.vlgmr.msra.gmra.mxu1 %vm334_vm1, %v303_v12  ;;  %v609_v48 = vld [vmem:[%s1441_s6 + $0xf0] sm:$0xff]  ;;  %v608_v51 = vld [vmem:[%s1441_s6 + $0xe8] sm:$0xff]  ;;  %v607_v52 = vld [vmem:[%s1441_s6 + $0xe0] sm:$0xff] }
  0x1b   : > { %611 = vmatpush.msrb.mxu1 %v594_v24  ;;  %631 = vmatpush.msra.mxu3 %v610_v45  ;;  %v606_v53 = vld [vmem:[%s1441_s6 + $0xd8] sm:$0xff]  ;;  %v583_v54 = vld [vmem:[%s1441_s6 + $0x20] sm:$0xff]  ;;  %v605_v55 = vld [vmem:[%s1441_s6 + $0xd0] sm:$0xff] }
  0x1c   : > { %v604_v58 = vld [vmem:[%s1441_s6 + $0xc8] sm:$0xff]  ;;  %v1263_v59 = vld [vmem:[%s1381_s23 + $0x52] ss:$8 sm:$0x3]  ;;  %v603_v60 = vld [vmem:[%s1441_s6 + $0xc0] sm:$0xff] }
  0x1d   : > { %612 = vmatpush.msrb.mxu1 %v593_v25  ;;  %632 = vmatpush.msra.mxu3 %v609_v48  ;;  %v1480_v61 = vperm.slane %v1263_v59, 0  ;;  %v1482_v62 = vperm.slane %v1263_v59, 1  ;;  %v602_v63 = vld [vmem:[%s1441_s6 + $0xb8] sm:$0xff]  ;;  %v601_v2 = vld [vmem:[%s1441_s6 + $0xb0] sm:$0xff]  ;;  %v600_v9 = vld [vmem:[%s1441_s6 + $0xa8] sm:$0xff] }
  0x1e   : > { %v582_v10 = vld [vmem:[%s1441_s6 + $0x18] sm:$0xff]  ;;  %v581_v11 = vld [vmem:[%s1441_s6 + $0x10] sm:$0xff]  ;;  %v599_v12 = vld [vmem:[%s1441_s6 + $0xa0] sm:$0xff] }
  0x1f   : > { %613 = vmatpush.msrb.mxu1 %v592_v26  ;;  %633 = vmatpush.msra.mxu3 %v608_v51  ;;  %v579_v26 = vld [vmem:[%s1441_s6] sm:$0xff] }
  0x21   : > { %614 = vmatpush.msrb.mxu1 %v591_v29  ;;  %634 = vmatpush.msra.mxu3 %v607_v52 }
  0x22   : > { %1266 = vmatmul.msk.f32.gmra.mxu0 %vm334_vm1, %v304_v13  ;;  %1279 = vmatmul.msk.f32.gmra.mxu1 %vm334_vm1, %v304_v13 }
  0x23   : > { %615 = vmatpush.msrb.mxu1 %v590_v32  ;;  %635 = vmatpush.msra.mxu3 %v606_v53 }
  0x25   : > { %616 = vmatpush.msrb.mxu1 %v589_v35  ;;  %636 = vmatpush.msra.mxu3 %v605_v55 }
  0x27   : > { %617 = vmatpush.msrb.mxu1 %v588_v36  ;;  %637 = vmatpush.msra.mxu3 %v604_v58 }
  0x29   : > { %618 = vmatpush.msrb.mxu1 %v587_v39  ;;  %638 = vmatpush.msra.mxu3 %v603_v60 }
  0x2a   : > { %1267 = vmatmul.msk.f32.gmra.mxu0 %vm334_vm1, %v305_v14  ;;  %1280 = vmatmul.msk.f32.gmra.mxu1 %vm334_vm1, %v305_v14 }
  0x2b   : > { %619 = vmatpush.msrb.mxu1 %v586_v42  ;;  %639 = vmatpush.msra.mxu3 %v602_v63  ;;  %v595_v42 = vld [vmem:[%s1441_s6 + $0x80] sm:$0xff] }
  0x2d   : > { %620 = vmatpush.msrb.mxu1 %v585_v46  ;;  %640 = vmatpush.msra.mxu3 %v601_v2 }
  0x2f   : > { %621 = vmatpush.msrb.mxu1 %v584_v47  ;;  %641 = vmatpush.msra.mxu3 %v600_v9 }
  0x31   : > { %622 = vmatpush.msrb.mxu1 %v583_v54  ;;  %642 = vmatpush.msra.mxu3 %v599_v12 }
  0x32   : > { %1268 = vmatmul.msk.f32.gmra.mxu0 %vm334_vm1, %v306_v15  ;;  %1281 = vmatmul.msk.f32.gmra.mxu1 %vm334_vm1, %v306_v15  ;;  %v598_v15 = vld [vmem:[%s1441_s6 + $0x98] sm:$0xff] }
  0x33   : > { %623 = vmatpush.msrb.mxu1 %v582_v10  ;;  %643 = vmatpush.msra.mxu3 %v598_v15 }
  0x35   : > { %624 = vmatpush.msrb.mxu1 %v581_v11 }
  0x3a   : > { %1269 = vmatmul.msk.f32.gmra.mxu0 %vm334_vm1, %v307_v16  ;;  %1282 = vmatmul.msk.f32.gmra.mxu1 %vm334_vm1, %v307_v16 }
  0x42   : > { %1270 = vmatmul.msk.f32.gmra.mxu0 %vm334_vm1, %v308_v17  ;;  %1283 = vmatmul.msk.f32.gmra.mxu1 %vm334_vm1, %v308_v17 }
  0x4a   : > { %1271 = vmatmul.msk.f32.gmra.mxu0 %vm334_vm1, %v309_v18  ;;  %1284 = vmatmul.msk.f32.gmra.mxu1 %vm334_vm1, %v309_v18  ;;  %v580_v18 = vld [vmem:[%s1441_s6 + $0x8] sm:$0xff] }
  0x4b   : > { %625 = vmatpush.msrb.mxu1 %v580_v18 }
  0x4d   : > { %626 = vmatpush.msrb.mxu1 %v579_v26 }
  0x52   : > { %1272 = vmatmul.msk.f32.gmra.mxu0 %vm334_vm1, %v310_v19  ;;  %1285 = vmatmul.msk.f32.gmra.mxu1 %vm334_vm1, %v310_v19 }
  0x5a   : > { %1273 = vmatmul.msk.f32.gmra.mxu0 %vm334_vm1, %v311_v20  ;;  %1286 = vmatmul.msk.f32.gmra.mxu1 %vm334_vm1, %v311_v20 }
  0x62   : > { %1274 = vmatmul.msk.f32.gmra.mxu0 %vm334_vm1, %v312_v21  ;;  %1287 = vmatmul.msk.f32.gmra.mxu1 %vm334_vm1, %v312_v21 }
  0x6a   : > { %1275 = vmatmul.msk.f32.gmra.mxu0 %vm334_vm1, %v313_v22  ;;  %1288 = vmatmul.msk.f32.gmra.mxu1 %vm334_vm1, %v313_v22 }
  0x72   : > { %1276 = vmatmul.msk.f32.gmra.mxu0 %vm334_vm1, %v314_v23  ;;  %1289 = vmatmul.msk.f32.gmra.mxu1 %vm334_vm1, %v314_v23  ;;  %v597_v23 = vld [vmem:[%s1441_s6 + $0x90] sm:$0xff] }
  0x73   : > { %644 = vmatpush.msra.mxu3 %v597_v23 }
  0x97   : > { %v395_v27 = vpop.f32.mrf.mxu0  ;;  %v448_v28 = vpop.f32.mrf.mxu1 }
  0x98   : > { %v1493_v3 = vadd.f32 %v395_v27, %v1480_v61  ;;  %v1496_v4 = vadd.f32 %v448_v28, %v1482_v62 }
  0x9a   : > { %v484_v19 = vmul.f32 %v1493_v3, %v1493_v3  ;;  %v485_v20 = vmul.f32 %v1496_v4, %v1496_v4 }
  0x9f   : > { %v398_v30 = vpop.f32.mrf.mxu0  ;;  %v451_v31 = vpop.f32.mrf.mxu1 }
  0xa0   : > { %v1486_v0 = vadd.f32 %v398_v30, %v1480_v61  ;;  %v1489_v1 = vadd.f32 %v451_v31, %v1482_v62  ;;  %v596_v31 = vld [vmem:[%s1441_s6 + $0x88] sm:$0xff] }
  0xa1   : > { %645 = vmatpush.msra.mxu3 %v596_v31 }
  0xa2   : > { %v488_v13 = vmul.f32 %v1486_v0, %v1486_v0  ;;  %v489_v14 = vmul.f32 %v1489_v1, %v1489_v1  ;;  %v486_v27 = vadd.f32 %v1486_v0, %v1493_v3  ;;  %v487_v29 = vadd.f32 %v1489_v1, %v1496_v4 }
  0xa3   : > { %646 = vmatpush.msra.mxu3 %v595_v42 }
  0xa4   : > { %v490_v28 = vadd.f32 %v488_v13, %v484_v19  ;;  %v491_v30 = vadd.f32 %v489_v14, %v485_v20 }
  0xa7   : > { %v401_v33 = vpop.f32.mrf.mxu0  ;;  %v454_v34 = vpop.f32.mrf.mxu1 }
  0xa8   : > { %v1499_v5 = vadd.f32 %v401_v33, %v1480_v61  ;;  %v1502_v6 = vadd.f32 %v454_v34, %v1482_v62 }
  0xaa   : > { %v494_v21 = vmul.f32 %v1499_v5, %v1499_v5  ;;  %v495_v22 = vmul.f32 %v1502_v6, %v1502_v6  ;;  %v492_v36 = vadd.f32 %v486_v27, %v1499_v5 }
  0xac   : > { %v497_v39 = vadd.f32 %v495_v22, %v491_v30 }
  0xaf   : > { %v404_v37 = vpop.f32.mrf.mxu0  ;;  %v457_v38 = vpop.f32.mrf.mxu1 }
  0xb0   : > { %v1518_v16 = vadd.f32 %v404_v37, %v1480_v61  ;;  %v1521_v17 = vadd.f32 %v457_v38, %v1482_v62  ;;  %v496_v37 = vadd.f32 %v494_v21, %v490_v28  ;;  %v493_v38 = vadd.f32 %v487_v29, %v1502_v6 }
  0xb2   : > { %v500_v32 = vmul.f32 %v1518_v16, %v1518_v16  ;;  %v501_v33 = vmul.f32 %v1521_v17, %v1521_v17  ;;  %v498_v47 = vadd.f32 %v492_v36, %v1518_v16  ;;  %v499_v48 = vadd.f32 %v493_v38, %v1521_v17 }
  0xb4   : > { %v502_v51 = vadd.f32 %v500_v32, %v496_v37  ;;  %v503_v52 = vadd.f32 %v501_v33, %v497_v39 }
  0xb7   : > { %v1451_v40 = vpop.f32.mrf.mxu0  ;;  %v1453_v41 = vpop.f32.mrf.mxu1 }
  0xb8   : > { %v1535_v24 = vadd.f32 %v1451_v40, %v1480_v61  ;;  %v1539_v25 = vadd.f32 %v1453_v41, %v1482_v62 }
  0xba   : > { %v506_v45 = vmul.f32 %v1535_v24, %v1535_v24  ;;  %v505_v55 = vadd.f32 %v499_v48, %v1539_v25 }
  0xbc   : > { %v508_v59 = vadd.f32 %v506_v45, %v502_v51 }
  0xbf   : > { %v1456_v43 = vpop.f32.mrf.mxu0  ;;  %v1458_v44 = vpop.f32.mrf.mxu1 }
  0xc0   : > { %v1553_v34 = vadd.f32 %v1456_v43, %v1480_v61  ;;  %v1557_v35 = vadd.f32 %v1458_v44, %v1482_v62  ;;  %v507_v43 = vmul.f32 %v1539_v25, %v1539_v25 }
  0xc2   : > { %v512_v53 = vmul.f32 %v1553_v34, %v1553_v34  ;;  %v513_v54 = vmul.f32 %v1557_v35, %v1557_v35  ;;  %v509_v60 = vadd.f32 %v507_v43, %v503_v52  ;;  %v511_v11 = vadd.f32 %v505_v55, %v1557_v35 }
  0xc4   : > { %v515_v12 = vadd.f32 %v513_v54, %v509_v60 }
  0xc7   : > { %v1464_v49 = vpop.f32.mrf.mxu0  ;;  %v1466_v50 = vpop.f32.mrf.mxu1 }
  0xc8   : > { %v1568_v44 = vadd.f32 %v1464_v49, %v1480_v61  ;;  %v1572_v46 = vadd.f32 %v1466_v50, %v1482_v62  ;;  %v504_v49 = vadd.f32 %v498_v47, %v1535_v24 }
  0xca   : > { %v518_v63 = vmul.f32 %v1568_v44, %v1568_v44  ;;  %v519_v2 = vmul.f32 %v1572_v46, %v1572_v46  ;;  %v510_v10 = vadd.f32 %v504_v49, %v1553_v34  ;;  %v517_v21 = vadd.f32 %v511_v11, %v1572_v46 }
  0xcc   : > { %v516_v19 = vadd.f32 %v510_v10, %v1568_v44  ;;  %v521_v22 = vadd.f32 %v519_v2, %v515_v12 }
  0xcf   : > { %v1473_v56 = vpop.f32.mrf.mxu0  ;;  %v1475_v57 = vpop.f32.mrf.mxu1 }
  0xd0   : > { %v1584_v50 = vadd.f32 %v1473_v56, %v1480_v61  ;;  %v1588_v58 = vadd.f32 %v1475_v57, %v1482_v62  ;;  %v514_v57 = vadd.f32 %v512_v53, %v508_v59 }
  0xd2   : > { %v524_v13 = vmul.f32 %v1584_v50, %v1584_v50  ;;  %v525_v14 = vmul.f32 %v1588_v58, %v1588_v58  ;;  %v520_v20 = vadd.f32 %v518_v63, %v514_v57  ;;  %v522_v29 = vadd.f32 %v516_v19, %v1584_v50 }
  0xd3   : > { %v523_v30 = vadd.f32 %v517_v21, %v1588_v58 }
  0xd4   : > { %v526_v31 = vadd.f32 %v524_v13, %v520_v20  ;;  %v527_v32 = vadd.f32 %v525_v14, %v521_v22 }
  0xd7   : > { %v1504_v7 = vpop.f32.mrf.mxu0  ;;  %v1506_v8 = vpop.f32.mrf.mxu1 }
  0xd8   : > { %v1596_v9 = vadd.f32 %v1504_v7, %v1480_v61  ;;  %v1600_v56 = vadd.f32 %v1506_v8, %v1482_v62 }
  0xda   : > { %v530_v23 = vmul.f32 %v1596_v9, %v1596_v9  ;;  %v531_v26 = vmul.f32 %v1600_v56, %v1600_v56  ;;  %v528_v37 = vadd.f32 %v522_v29, %v1596_v9  ;;  %v529_v38 = vadd.f32 %v523_v30, %v1600_v56 }
  0xdc   : > { %v532_v39 = vadd.f32 %v530_v23, %v526_v31 }
  0xdf   : > { %v422_v40 = vpop.f32.mrf.mxu0  ;;  %v475_v41 = vpop.f32.mrf.mxu1 }
  0xe0   : > { %v1609_v15 = vadd.f32 %v422_v40, %v1480_v61  ;;  %v1612_v7 = vadd.f32 %v475_v41, %v1482_v62  ;;  %v533_v40 = vadd.f32 %v531_v26, %v527_v32 }
  0xe2   : > { %v536_v33 = vmul.f32 %v1609_v15, %v1609_v15  ;;  %v537_v36 = vmul.f32 %v1612_v7, %v1612_v7  ;;  %v534_v45 = vadd.f32 %v528_v37, %v1609_v15  ;;  %v535_v43 = vadd.f32 %v529_v38, %v1612_v7 }
  0xe4   : > { %v538_v47 = vadd.f32 %v536_v33, %v532_v39  ;;  %v539_v48 = vadd.f32 %v537_v36, %v533_v40 }
  0xe7   : > { %v425_v8 = vpop.f32.mrf.mxu0  ;;  %v478_v18 = vpop.f32.mrf.mxu1 }
  0xe8   : > { %v1621_v27 = vadd.f32 %v425_v8, %v1480_v61  ;;  %v1624_v28 = vadd.f32 %v478_v18, %v1482_v62 }
  0xea   : > { %v542_v41 = vmul.f32 %v1621_v27, %v1621_v27  ;;  %v543_v42 = vmul.f32 %v1624_v28, %v1624_v28  ;;  %v540_v53 = vadd.f32 %v534_v45, %v1621_v27  ;;  %v541_v54 = vadd.f32 %v535_v43, %v1624_v28 }
  0xec   : > { %v544_v59 = vadd.f32 %v542_v41, %v538_v47  ;;  %v545_v60 = vadd.f32 %v543_v42, %v539_v48  ;;  %v1334_v47 = vmov 1152.0  }
  0xed   : > { %1314 = vrcp.f32 %v1334_v47  ;;  %v855_v47 = vld [vmem:[%s1664_s10 + $0x48] sm:$0xff] }
  0xef   : > { %v428_v51 = vpop.f32.mrf.mxu0  ;;  %v481_v52 = vpop.f32.mrf.mxu1 }
  0xf0   : > { %v1643_v49 = vadd.f32 %v428_v51, %v1480_v61  ;;  %v1646_v55 = vadd.f32 %v481_v52, %v1482_v62 }
  0xf2   : > { %v546_v63 = vadd.f32 %v540_v53, %v1643_v49  ;;  %v548_v2 = vmul.f32 %v1643_v49, %v1643_v49  ;;  %v547_v10 = vadd.f32 %v541_v54, %v1646_v55  ;;  %v549_v57 = vmul.f32 %v1646_v55, %v1646_v55  ;;  %v680_v53 = vld [vmem:[%s1381_s23 + $0x78] sm:$0xff]  ;;  %v678_v54 = vld [vmem:[%s1381_s23 + $0x68] sm:$0xff] }
  0xf3   : > { %v1315_v48 = vpop.eup %1314  ;;  %719 = vmatpush.msrb.mxu3 %v680_v53  ;;  %v853_v53 = vld [vmem:[%s1664_s10 + $0x38] sm:$0xff] }
  0xf4   : > { %v550_v11 = vadd.f32 %v548_v2, %v544_v59  ;;  %v552_v12 = vrot.slane %v546_v63, 4  ;;  %v551_v13 = vadd.f32 %v549_v57, %v545_v60  ;;  %v558_v61 = vrot.slane %v547_v10, 4  ;;  %v679_v59 = vld [vmem:[%s1381_s23 + $0x70] sm:$0xff]  ;;  %v677_v60 = vld [vmem:[%s1381_s23 + $0x60] sm:$0xff] }
  0xf5   : > { %v652_v51 = vmul.f32 1152.0, %v1315_v48  ;;  %699 = vmatpush.msra.mxu2 %v679_v59  ;;  %720 = vmatpush.msrb.mxu3 %v678_v54  ;;  %vm656_vm3 = vweird.f32 %v1315_v48  ;;  %v902_v54 = vld [vmem:[%s1664_s10 + $0xb8] sm:$0xff]  ;;  %v852_v59 = vld [vmem:[%s1664_s10 + $0x30] sm:$0xff] }
  0xf6   : > { %v553_v14 = vadd.f32 %v552_v12, %v546_v63  ;;  %v564_v8 = vrot.slane %v550_v11, 4  ;;  %v559_v62 = vadd.f32 %v558_v61, %v547_v10  ;;  %v570_v18 = vrot.slane %v551_v13, 4  ;;  %v910_v61 = vld [vmem:[%s1664_s10 + $0xf8] sm:$0xff] }
  0xf7   : > { %v653_v52 = vsub.f32 1.0, %v652_v51  ;;  %700 = vmatpush.msra.mxu2 %v677_v60  ;;  %v854_v51 = vld [vmem:[%s1664_s10 + $0x40] sm:$0xff]  ;;  %v901_v60 = vld [vmem:[%s1664_s10 + $0xb0] sm:$0xff] }
  0xf8   : > { %v554_v19 = vrot.slane %v553_v14, 2  ;;  %v565_v20 = vadd.f32 %v564_v8, %v550_v11  ;;  %v560_v21 = vrot.slane %v559_v62, 2  ;;  %v571_v22 = vadd.f32 %v570_v18, %v551_v13  ;;  %v861_v13 = vld [vmem:[%s1664_s10 + $0x78] sm:$0xff] }
  0xf9   : > { %v654_v63 = vmul.f32 %v1315_v48, %v653_v52  ;;  %862 = vmatpush.msrb.mxu2 %v861_v13  ;;  %v903_v52 = vld [vmem:[%s1664_s10 + $0xc0] sm:$0xff]  ;;  %v848_v13 = vld [vmem:[%s1664_s10 + $0x10] sm:$0xff] }
  0xfa   : > { %v555_v23 = vadd.f32 %v554_v19, %v553_v14  ;;  %v566_v26 = vrot.slane %v565_v20, 2  ;;  %v561_v29 = vadd.f32 %v560_v21, %v559_v62  ;;  %v572_v30 = vrot.slane %v571_v22, 2 }
  0xfb   : > { %v655_v2 = vadd.f32 %v1315_v48, %v654_v63  ;;  %v851_v63 = vld [vmem:[%s1664_s10 + $0x28] sm:$0xff] }
  0xfc   : > { %v556_v31 = vrot.slane %v555_v23, 1  ;;  %v567_v32 = vadd.f32 %v566_v26, %v565_v20  ;;  %v562_v33 = vrot.slane %v561_v29, 1  ;;  %v573_v36 = vadd.f32 %v572_v30, %v571_v22 }
  0xfd   : > { %v657_v11 = vsel %vm656_vm3, %v1315_v48, %v655_v2  ;;  %v904_v48 = vld [vmem:[%s1664_s10 + $0xc8] sm:$0xff] }
  0xfe   : > { %v568_v37 = vrot.slane %v567_v32, 1  ;;  %v574_v38 = vrot.slane %v573_v36, 1  ;;  %v557_v39 = vadd.f32 %v556_v31, %v555_v23  ;;  %v563_v41 = vadd.f32 %v562_v33, %v561_v29  ;;  %v860_v33 = vld [vmem:[%s1664_s10 + $0x70] sm:$0xff]  ;;  %v900_v2 = vld [vmem:[%s1664_s10 + $0xa8] sm:$0xff] }
  0xff   : > { %863 = vmatpush.msrb.mxu2 %v860_v33 }
 0x100   : > { %v569_v40 = vadd.f32 %v568_v37, %v567_v32  ;;  %v575_v42 = vadd.f32 %v574_v38, %v573_v36  ;;  %v909_v36 = vld [vmem:[%s1664_s10 + $0xf0] sm:$0xff]  ;;  %v859_v37 = vld [vmem:[%s1664_s10 + $0x68] sm:$0xff] }
 0x101   : > { %v908_v38 = vld [vmem:[%s1664_s10 + $0xe8] sm:$0xff]  ;;  %864 = vmatpush.msrb.mxu2 %v859_v37 }
 0x102   : > { %v577_v45 = vsel %vm576_vm2, %v557_v39, %v569_v40  ;;  %v578_v43 = vsel %vm576_vm2, %v563_v41, %v575_v42  ;;  %v858_v39 = vld [vmem:[%s1664_s10 + $0x60] sm:$0xff]  ;;  %v857_v41 = vld [vmem:[%s1664_s10 + $0x58] sm:$0xff] }
 0x103   : > { %627 = vmatmul.f32.vlgmr.msrb.gmra.mxu1 %v577_v45  ;;  %647 = vmatmul.f32.vlgmr.msra.gmra.mxu3 %v578_v43  ;;  %v907_v40 = vld [vmem:[%s1664_s10 + $0xe0] sm:$0xff]  ;;  %v906_v42 = vld [vmem:[%s1664_s10 + $0xd8] sm:$0xff]  ;;  %v856_v45 = vld [vmem:[%s1664_s10 + $0x50] sm:$0xff] }
 0x104   : > { %911 = vmatpush.msra.mxu3 %v910_v61  ;;  %865 = vmatpush.msrb.mxu2 %v858_v39  ;;  %v905_v43 = vld [vmem:[%s1664_s10 + $0xd0] sm:$0xff]  ;;  %v952_v39 = vld [vmem:[%s1664_s10 + $0x140] sm:$0xff] }
 0x105   : > { %v897_v61 = vld [vmem:[%s1664_s10 + $0x90] sm:$0xff] }
 0x106   : > { %912 = vmatpush.msra.mxu3 %v909_v36  ;;  %866 = vmatpush.msrb.mxu2 %v857_v41  ;;  %v953_v36 = vld [vmem:[%s1664_s10 + $0x148] sm:$0xff]  ;;  %v1293_v41 = vld [vmem:[%s1381_s23 + $0x54] ss:$8 sm:$0x3] }
 0x108   : > { %913 = vmatpush.msra.mxu3 %v908_v38  ;;  %867 = vmatpush.msrb.mxu2 %v856_v45 }
 0x10a   : > { %914 = vmatpush.msra.mxu3 %v907_v40  ;;  %868 = vmatpush.msrb.mxu2 %v855_v47  ;;  %v950_v47 = vld [vmem:[%s1664_s10 + $0x130] sm:$0xff] }
 0x10c   : > { %915 = vmatpush.msra.mxu3 %v906_v42  ;;  %869 = vmatpush.msrb.mxu2 %v854_v51  ;;  %v949_v51 = vld [vmem:[%s1664_s10 + $0x128] sm:$0xff] }
 0x10e   : > { %916 = vmatpush.msra.mxu3 %v905_v43  ;;  %870 = vmatpush.msrb.mxu2 %v853_v53  ;;  %v951_v43 = vld [vmem:[%s1664_s10 + $0x138] sm:$0xff] }
 0x110   : > { %917 = vmatpush.msra.mxu3 %v904_v48  ;;  %871 = vmatpush.msrb.mxu2 %v852_v59 }
 0x112   : > { %918 = vmatpush.msra.mxu3 %v903_v52  ;;  %872 = vmatpush.msrb.mxu2 %v851_v63 }
 0x114   : > { %919 = vmatpush.msra.mxu3 %v902_v54 }
 0x116   : > { %920 = vmatpush.msra.mxu3 %v901_v60 }
 0x118   : > { %921 = vmatpush.msra.mxu3 %v900_v2 }
 0x180   : > { %v628_v10 = vpop.f32.mrf.mxu1 }
 0x186   : > { %v648_v57 = vpop.f32.mrf.mxu3 }
 0x187   : > { %v649_v12 = vadd.f32 %v648_v57, %v628_v10  ;;  %v850_v10 = vld [vmem:[%s1664_s10 + $0x20] sm:$0xff] }
 0x188   : > { %v899_v57 = vld [vmem:[%s1664_s10 + $0xa0] sm:$0xff]  ;;  %873 = vmatpush.msrb.mxu2 %v850_v10 }
 0x189   : > { %v658_v14 = vmul.f32 %v657_v11, %v649_v12  ;;  %v849_v11 = vld [vmem:[%s1664_s10 + $0x18] sm:$0xff]  ;;  %922 = vmatpush.msra.mxu3 %v899_v57  ;;  %v948_v10 = vld [vmem:[%s1664_s10 + $0x120] sm:$0xff] }
 0x18a   : > { %v898_v12 = vld [vmem:[%s1664_s10 + $0x98] sm:$0xff]  ;;  %874 = vmatpush.msrb.mxu2 %v849_v11 }
 0x18b   : > { %v659_v8 = vmul.f32 %v658_v14, %v658_v14  ;;  %923 = vmatpush.msra.mxu3 %v898_v12 }
 0x18c   : > { %875 = vmatpush.msrb.mxu2 %v848_v13 }
 0x18d   : > { %v661_v62 = vrot.slane %v659_v8, 7  ;;  %v896_v8 = vld [vmem:[%s1664_s10 + $0x88] sm:$0xff]  ;;  %924 = vmatpush.msra.mxu3 %v897_v61 }
 0x18f   : > { %v663_v18 = vsub.f32 %v658_v14, %v661_v62  ;;  %v846_v62 = vld [vmem:[%s1664_s10] sm:$0xff]  ;;  %925 = vmatpush.msra.mxu3 %v896_v8 }
 0x191   : > { %v664_v19 = vmax.f32 %v663_v18, 0.0  ;;  %v895_v18 = vld [vmem:[%s1664_s10 + $0x80] sm:$0xff] }
 0x192   : > { %926 = vmatpush.msra.mxu3 %v895_v18 }
 0x193   : > { %v665_v20 = vadd.f32 1e-05, %v664_v19 }
 0x195   : > { %1316 = vrsqrt.f32 %v665_v20  ;;  %vm672_vm5 = vweird.f32 %v665_v20 }
 0x19b   : > { %v1317_v21 = vpop.eup %1316 }
 0x19c   : > { %v667_v22 = vmul.f32 %v1317_v21, %v665_v20  ;;  %vm673_vm4 = vweird.f32 %v1317_v21 }
 0x19d   : > { %vm674_vm6 = vmor %vm672_vm5, %vm673_vm4 }
 0x19e   : > { %v668_v23 = vmul.f32 %v1317_v21, %v667_v22  ;;  %v958_v22 = vld [vmem:[%s1664_s10 + $0x170] sm:$0xff] }
 0x1a0   : > { %v669_v26 = vmul.f32 0.5, %v668_v23  ;;  %v957_v23 = vld [vmem:[%s1664_s10 + $0x168] sm:$0xff] }
 0x1a2   : > { %v670_v29 = vsub.f32 1.5, %v669_v26  ;;  %v956_v26 = vld [vmem:[%s1664_s10 + $0x160] sm:$0xff] }
 0x1a4   : > { %v671_v30 = vmul.f32 %v1317_v21, %v670_v29  ;;  %v1292_v29 = vld [vmem:[%s1381_s23 + $0x53] ss:$8 sm:$0x3] }
 0x1a6   : > { %v675_v31 = vsel %vm674_vm6, %v1317_v21, %v671_v30  ;;  %v959_v21 = vld [vmem:[%s1664_s10 + $0x178] sm:$0xff] }
 0x1a7   : > { %v676_v32 = vsel %vm576_vm2, %v658_v14, %v675_v31  ;;  %v847_v14 = vld [vmem:[%s1664_s10 + $0x8] sm:$0xff]  ;;  %v955_v30 = vld [vmem:[%s1664_s10 + $0x158] sm:$0xff]  ;;  %v954_v31 = vld [vmem:[%s1664_s10 + $0x150] sm:$0xff] }
 0x1a8   : > { %1290 = vmatmul.msk.f32.vlgmr.msra.gmra.mxu2 %vm681_vm7, %v676_v32  ;;  %1291 = vmatmul.msk.f32.vlgmr.msrb.gmra.mxu3 %vm681_vm7, %v676_v32 }
 0x1a9   : > { %876 = vmatpush.msrb.mxu2 %v847_v14  ;;  %v947_v14 = vld [vmem:[%s1664_s10 + $0x118] sm:$0xff] }
 0x1ab   : > { %877 = vmatpush.msrb.mxu2 %v846_v62 }
 0x1ad   : > { %960 = vmatpush.msra.mxu2 %v959_v21 }
 0x1af   : > { %961 = vmatpush.msra.mxu2 %v958_v22 }
 0x1b1   : > { %962 = vmatpush.msra.mxu2 %v957_v23 }
 0x1b3   : > { %963 = vmatpush.msra.mxu2 %v956_v26  ;;  %v945_v26 = vld [vmem:[%s1664_s10 + $0x108] sm:$0xff] }
 0x1b5   : > { %964 = vmatpush.msra.mxu2 %v955_v30 }
 0x1b7   : > { %965 = vmatpush.msra.mxu2 %v954_v31 }
 0x1b9   : > { %966 = vmatpush.msra.mxu2 %v953_v36 }
 0x1bb   : > { %967 = vmatpush.msra.mxu2 %v952_v39 }
 0x1bd   : > { %968 = vmatpush.msra.mxu2 %v951_v43 }
 0x1bf   : > { %969 = vmatpush.msra.mxu2 %v950_v47 }
 0x1c1   : > { %970 = vmatpush.msra.mxu2 %v949_v51 }
 0x1c3   : > { %971 = vmatpush.msra.mxu2 %v948_v10 }
 0x1c5   : > { %972 = vmatpush.msra.mxu2 %v947_v14 }
 0x22b   : > { %v702_v19 = vpop.f32.mrf.mxu2  ;;  %v722_v20 = vpop.f32.mrf.mxu3 }
 0x22c   : > { %729 = vst [vmem:[#allocation1] sm:$0xff] %v702_v19 }
 0x22d   : > { %730 = vst [vmem:[#allocation1 + $0x9] sm:$0xff] %v722_v20 }
 0x234   : > { %v732_v32 = vld [vmem:[#allocation1 + $0x1] ss:$9 sm:$0xff] }
 0x235   : > { %v734_v33 = vmul.f32 %v1292_v29, %v732_v32 }
 0x237   : > { %v1707_v37 = vperm.slane %v734_v33, 0  ;;  %v1709_v38 = vperm.slane %v734_v33, 1 }
 0x239   : > { %v743_v40 = vmul.f32 %v1709_v38, %v722_v20  ;;  %v742_v42 = vmul.f32 %v1707_v37, %v702_v19  ;;  %v750_v53 = vmul.f32 %v1707_v37, %v1493_v3  ;;  %v751_v54 = vmul.f32 %v1709_v38, %v1496_v4 }
 0x23a   : > { %v752_v59 = vmul.f32 %v1707_v37, %v1486_v0  ;;  %v753_v60 = vmul.f32 %v1709_v38, %v1489_v1  ;;  %v754_v63 = vmul.f32 %v1707_v37, %v1499_v5  ;;  %v755_v2 = vmul.f32 %v1709_v38, %v1502_v6 }
 0x23b   : > { %v746_v45 = vrot.slane %v743_v40, 7  ;;  %v756_v4 = vmul.f32 %v1707_v37, %v1518_v16  ;;  %v757_v0 = vmul.f32 %v1709_v38, %v1521_v17  ;;  %v758_v1 = vmul.f32 %v1707_v37, %v1535_v24 }
 0x23c   : > { %v759_v5 = vmul.f32 %v1709_v38, %v1539_v25  ;;  %v760_v6 = vmul.f32 %v1707_v37, %v1553_v34  ;;  %v761_v11 = vmul.f32 %v1709_v38, %v1557_v35  ;;  %v946_v35 = vld [vmem:[%s1664_s10 + $0x110] sm:$0xff] }
 0x23d   : > { %v747_v48 = vsel %vm576_vm2, %v742_v42, %v746_v45  ;;  %973 = vmatpush.msra.mxu2 %v946_v35  ;;  %v944_v45 = vld [vmem:[%s1664_s10 + $0x100] sm:$0xff] }
 0x23e   : > { %v749_v52 = vsub.f32 %v1293_v41, %v747_v48 }
 0x23f   : > { %974 = vmatpush.msra.mxu2 %v945_v26 }
 0x240   : > { %v1732_v57 = vperm.slane %v749_v52, 0  ;;  %v1734_v3 = vperm.slane %v749_v52, 1  ;;  %v762_v52 = vmul.f32 %v1707_v37, %v1568_v44 }
 0x241   : > { %975 = vmatpush.msra.mxu2 %v944_v45 }
 0x242   : > { %v779_v16 = vadd.f32 %v1732_v57, %v750_v53  ;;  %v780_v12 = vadd.f32 %v1734_v3, %v751_v54  ;;  %v781_v17 = vadd.f32 %v1732_v57, %v752_v59  ;;  %v782_v13 = vadd.f32 %v1734_v3, %v753_v60 }
 0x243   : > { %v783_v24 = vadd.f32 %v1732_v57, %v754_v63  ;;  %v784_v25 = vadd.f32 %v1734_v3, %v755_v2  ;;  %v785_v61 = vadd.f32 %v1732_v57, %v756_v4  ;;  %v786_v34 = vadd.f32 %v1734_v3, %v757_v0 }
 0x244   : > { %v803_v8 = vmax.f32 %v779_v16, 0.0  ;;  %v804_v62 = vmax.f32 %v780_v12, 0.0  ;;  %v805_v18 = vmax.f32 %v781_v17, 0.0  ;;  %v806_v19 = vmax.f32 %v782_v13, 0.0 }
 0x245   : > { %v807_v20 = vmax.f32 %v783_v24, 0.0  ;;  %v808_v21 = vmax.f32 %v784_v25, 0.0  ;;  %v809_v22 = vmax.f32 %v785_v61, 0.0  ;;  %v810_v23 = vmax.f32 %v786_v34, 0.0 }
 0x246   : > { %v827_v29 = vmax.f32 %v803_v8, %v805_v18  ;;  %v828_v30 = vmax.f32 %v804_v62, %v806_v19  ;;  %v787_v31 = vadd.f32 %v1732_v57, %v758_v1  ;;  %v788_v32 = vadd.f32 %v1734_v3, %v759_v5 }
 0x247   : > { %v829_v33 = vmax.f32 %v807_v20, %v809_v22  ;;  %v830_v36 = vmax.f32 %v808_v21, %v810_v23  ;;  %v789_v39 = vadd.f32 %v1732_v57, %v760_v6  ;;  %v790_v40 = vadd.f32 %v1734_v3, %v761_v11 }
 0x248   : > { %v839_v41 = vmax.f32 %v827_v29, %v828_v30  ;;  %v811_v42 = vmax.f32 %v787_v31, 0.0  ;;  %v812_v47 = vmax.f32 %v788_v32, 0.0  ;;  %v763_v53 = vmul.f32 %v1709_v38, %v1572_v46 }
 0x249   : > { %v840_v43 = vmax.f32 %v829_v33, %v830_v36  ;;  %v813_v48 = vmax.f32 %v789_v39, 0.0  ;;  %v814_v51 = vmax.f32 %v790_v40, 0.0  ;;  %v764_v54 = vmul.f32 %v1707_v37, %v1584_v50  ;;  %v1029_v39 = vld [vmem:[%s1804_s14 + $0xb8] sm:$0xff]  ;;  %v1015_v40 = vld [vmem:[%s1804_s14 + $0x48] sm:$0xff] }
 0x24a   : > { %878 = vmatmul.f32.vlgmr.msrb.gmra.mxu2 %v839_v41  ;;  %v765_v59 = vmul.f32 %v1709_v38, %v1588_v58  ;;  %v791_v60 = vadd.f32 %v1732_v57, %v762_v52  ;;  %v792_v63 = vadd.f32 %v1734_v3, %v763_v53  ;;  %v766_v50 = vmul.f32 %v1707_v37, %v1596_v9  ;;  %v1028_v41 = vld [vmem:[%s1804_s14 + $0xb0] sm:$0xff] }
 0x24b   : > { %927 = vmatmul.f32.vlgmr.msra.gmra.mxu3 %v840_v43  ;;  %v831_v2 = vmax.f32 %v811_v42, %v813_v48  ;;  %v832_v10 = vmax.f32 %v812_v47, %v814_v51  ;;  %v793_v4 = vadd.f32 %v1732_v57, %v764_v54  ;;  %v767_v58 = vmul.f32 %v1709_v38, %v1600_v56  ;;  %v845_v42 = vld [vmem:[%s1381_s23 + $0x55] ss:$0 sm:$0xff]  ;;  %v1014_v47 = vld [vmem:[%s1804_s14 + $0x40] sm:$0xff]  ;;  %v1013_v54 = vld [vmem:[%s1804_s14 + $0x38] sm:$0xff] }
 0x24c   : > { %v794_v44 = vadd.f32 %v1734_v3, %v765_v59  ;;  %v815_v0 = vmax.f32 %v791_v60, 0.0  ;;  %v816_v1 = vmax.f32 %v792_v63, 0.0  ;;  %v768_v11 = vmul.f32 %v1707_v37, %v1609_v15  ;;  %1038 = vmatpush.msrb.mxu3 %v1029_v39  ;;  %v1026_v51 = vld [vmem:[%s1804_s14 + $0xa0] sm:$0xff]  ;;  %v1025_v59 = vld [vmem:[%s1804_s14 + $0x98] sm:$0xff]  ;;  %v1012_v60 = vld [vmem:[%s1804_s14 + $0x30] sm:$0xff] }
 0x24d   : > { %v841_v46 = vmax.f32 %v831_v2, %v832_v10  ;;  %v817_v5 = vmax.f32 %v793_v4, 0.0  ;;  %v769_v16 = vmul.f32 %v1709_v38, %v1612_v7  ;;  %v795_v12 = vadd.f32 %v1732_v57, %v766_v50  ;;  %v1011_v10 = vld [vmem:[%s1804_s14 + $0x28] sm:$0xff]  ;;  %v1008_v50 = vld [vmem:[%s1804_s14 + $0x10] sm:$0xff] }
 0x24e   : > { %v818_v6 = vmax.f32 %v794_v44, 0.0  ;;  %v796_v17 = vadd.f32 %v1734_v3, %v767_v58  ;;  %v797_v25 = vadd.f32 %v1732_v57, %v768_v11  ;;  %v770_v62 = vmul.f32 %v1707_v37, %v1621_v27  ;;  %1039 = vmatpush.msrb.mxu3 %v1028_v41  ;;  %v1007_v58 = vld [vmem:[%s1804_s14 + $0x8] sm:$0xff] }
 0x24f   : > { %v833_v13 = vmax.f32 %v815_v0, %v817_v5  ;;  %v798_v9 = vadd.f32 %v1734_v3, %v769_v16  ;;  %v819_v61 = vmax.f32 %v795_v12, 0.0  ;;  %v771_v18 = vmul.f32 %v1709_v38, %v1624_v28  ;;  %v1009_v5 = vld [vmem:[%s1804_s14 + $0x18] sm:$0xff] }
 0x250   : > { %v834_v24 = vmax.f32 %v816_v1, %v818_v6  ;;  %v820_v56 = vmax.f32 %v796_v17, 0.0  ;;  %v821_v14 = vmax.f32 %v797_v25, 0.0  ;;  %v772_v19 = vmul.f32 %v1707_v37, %v1643_v49 }
 0x251   : > { %v822_v35 = vmax.f32 %v798_v9, 0.0  ;;  %v773_v20 = vmul.f32 %v1709_v38, %v1646_v55  ;;  %v799_v21 = vadd.f32 %v1732_v57, %v770_v62  ;;  %v800_v22 = vadd.f32 %v1734_v3, %v771_v18  ;;  %v1019_v62 = vld [vmem:[%s1804_s14 + $0x68] sm:$0xff]  ;;  %v1018_v18 = vld [vmem:[%s1804_s14 + $0x60] sm:$0xff] }
 0x252   : > { %881 = vmatmul.f32.gmra.mxu2 %v840_v43  ;;  %v842_v34 = vmax.f32 %v833_v13, %v834_v24  ;;  %v835_v15 = vmax.f32 %v819_v61, %v821_v14  ;;  %v801_v23 = vadd.f32 %v1732_v57, %v772_v19  ;;  %v1017_v57 = vld [vmem:[%s1804_s14 + $0x58] sm:$0xff]  ;;  %v1027_v43 = vld [vmem:[%s1804_s14 + $0xa8] sm:$0xff]  ;;  %v1006_v14 = vld [vmem:[%s1804_s14] sm:$0xff] }
 0x253   : > { %930 = vmatmul.f32.gmra.mxu3 %v841_v46  ;;  %v836_v8 = vmax.f32 %v820_v56, %v822_v35  ;;  %v802_v26 = vadd.f32 %v1734_v3, %v773_v20  ;;  %v823_v29 = vmax.f32 %v799_v21, 0.0  ;;  %v824_v27 = vmax.f32 %v800_v22, 0.0  ;;  %v1016_v3 = vld [vmem:[%s1804_s14 + $0x50] sm:$0xff]  ;;  %1061 = vmatpush.msrb.mxu2 %v1017_v57  ;;  %v1023_v35 = vld [vmem:[%s1804_s14 + $0x88] sm:$0xff] }
 0x254   : > { %v825_v30 = vmax.f32 %v801_v23, 0.0  ;;  %1040 = vmatpush.msrb.mxu3 %v1027_v43  ;;  %v1024_v56 = vld [vmem:[%s1804_s14 + $0x90] sm:$0xff]  ;;  %v1336_v23 = vmov 8.0  }
 0x255   : > { %v843_v7 = vmax.f32 %v835_v15, %v836_v8  ;;  %v826_v31 = vmax.f32 %v802_v26, 0.0  ;;  %1062 = vmatpush.msrb.mxu2 %v1016_v3  ;;  %v1022_v15 = vld [vmem:[%s1804_s14 + $0x80] sm:$0xff]  ;;  %v1021_v8 = vld [vmem:[%s1804_s14 + $0x78] sm:$0xff]  ;;  %1318 = vrcp.f32 %v1336_v23 }
 0x256   : > { %v837_v28 = vmax.f32 %v823_v29, %v825_v30  ;;  %1041 = vmatpush.msrb.mxu3 %v1026_v51  ;;  %v1005_v29 = vld [vmem:[%s1804_s14 + $0xc0] sm:$0xff] }
 0x257   : > { %v838_v32 = vmax.f32 %v824_v27, %v826_v31  ;;  %1063 = vmatpush.msrb.mxu2 %v1015_v40  ;;  %v1077_v27 = vperm.slane %v1005_v29, 0 }
 0x258   : > { %1042 = vmatpush.msrb.mxu3 %v1025_v59 }
 0x259   : > { %v844_v49 = vmax.f32 %v837_v28, %v838_v32  ;;  %1064 = vmatpush.msrb.mxu2 %v1014_v47 }
 0x25a   : > { %884 = vmatmul.f32.gmra.mxu2 %v841_v46  ;;  %1043 = vmatpush.msrb.mxu3 %v1024_v56 }
 0x25b   : > { %933 = vmatmul.f32.gmra.mxu3 %v842_v34  ;;  %1065 = vmatpush.msrb.mxu2 %v1013_v54  ;;  %v1319_v26 = vpop.eup %1318 }
 0x25c   : > { %1044 = vmatpush.msrb.mxu3 %v1023_v35  ;;  %v1088_v30 = vmul.f32 8.0, %v1319_v26  ;;  %vm1092_vm10 = vweird.f32 %v1319_v26 }
 0x25d   : > { %1066 = vmatpush.msrb.mxu2 %v1012_v60 }
 0x25e   : > { %1045 = vmatpush.msrb.mxu3 %v1022_v15 }
 0x25f   : > { %1067 = vmatpush.msrb.mxu2 %v1011_v10 }
 0x260   : > { %1046 = vmatpush.msrb.mxu3 %v1021_v8 }
 0x262   : > { %887 = vmatmul.f32.gmra.mxu2 %v842_v34 }
 0x263   : > { %936 = vmatmul.f32.gmra.mxu3 %v843_v7 }
 0x26a   : > { %976 = vmatmul.f32.vlgmr.msra.gmra.mxu2 %v841_v46  ;;  %v1010_v46 = vld [vmem:[%s1804_s14 + $0x20] sm:$0xff] }
 0x26b   : > { %1068 = vmatpush.msrb.mxu2 %v1010_v46 }
 0x26d   : > { %1069 = vmatpush.msrb.mxu2 %v1009_v5 }
 0x26f   : > { %1070 = vmatpush.msrb.mxu2 %v1008_v50 }
 0x271   : > { %1071 = vmatpush.msrb.mxu2 %v1007_v58  ;;  %v1120_v58 = vperm.slane %v1005_v29, 1 }
 0x272   : > { %979 = vmatmul.f32.gmra.mxu2 %v842_v34 }
 0x273   : > { %1072 = vmatpush.msrb.mxu2 %v1006_v14 }
 0x27a   : > { %982 = vmatmul.f32.gmra.mxu2 %v843_v7  ;;  %v1020_v7 = vld [vmem:[%s1804_s14 + $0x70] sm:$0xff] }
 0x27b   : > { %1047 = vmatpush.msrb.mxu3 %v1020_v7 }
 0x27d   : > { %1048 = vmatpush.msrb.mxu3 %v1019_v62 }
 0x27f   : > { %1049 = vmatpush.msrb.mxu3 %v1018_v18 }
 0x282   : > { %985 = vmatmul.f32.gmra.mxu2 %v844_v49 }
 0x2cd   : > { %v879_v55 = vpop.f32.mrf.mxu2 }
 0x2ce   : > { %v928_v33 = vpop.f32.mrf.mxu3  ;;  %v891_v52 = vadd.f32 %v879_v55, %v845_v42  ;;  %v1089_v55 = vsub.f32 1.0, %v1088_v30 }
 0x2d0   : > { %v940_v63 = vadd.f32 %v928_v33, %v891_v52 }
 0x2d5   : > { %v882_v37 = vpop.f32.mrf.mxu2 }
 0x2d6   : > { %v931_v48 = vpop.f32.mrf.mxu3  ;;  %v892_v53 = vadd.f32 %v882_v37, %v845_v42 }
 0x2d8   : > { %v941_v2 = vadd.f32 %v931_v48, %v892_v53 }
 0x2dd   : > { %v885_v38 = vpop.f32.mrf.mxu2 }
 0x2de   : > { %v934_v6 = vpop.f32.mrf.mxu3  ;;  %v893_v16 = vadd.f32 %v885_v38, %v845_v42 }
 0x2e0   : > { %v942_v13 = vadd.f32 %v934_v6, %v893_v16 }
 0x2e5   : > { %v888_v36 = vpop.f32.mrf.mxu2 }
 0x2e6   : > { %v894_v12 = vadd.f32 %v888_v36, %v845_v42  ;;  %v937_v17 = vpop.f32.mrf.mxu3  ;;  %v1090_v36 = vmul.f32 %v1319_v26, %v1089_v55 }
 0x2e8   : > { %v943_v24 = vadd.f32 %v937_v17, %v894_v12  ;;  %v1091_v42 = vadd.f32 %v1319_v26, %v1090_v36  ;;  %v1122_v12 = vperm.slane %v1005_v29, 2 }
 0x2ea   : > { %v1093_v51 = vsel %vm1092_vm10, %v1319_v26, %v1091_v42 }
 0x2ed   : > { %v977_v45 = vpop.f32.mrf.mxu2 }
 0x2ee   : > { %v989_v44 = vadd.f32 %v977_v45, %v940_v63 }
 0x2f5   : > { %v980_v4 = vpop.f32.mrf.mxu2 }
 0x2f6   : > { %v990_v0 = vadd.f32 %v980_v4, %v941_v2 }
 0x2f8   : > { %v993_v1 = vmax.f32 %v989_v44, %v990_v0 }
 0x2fa   : > { %996 = vrot.lane.b32.xlu0 %v993_v1, %s1335_s15 }
 0x2fd   : > { %v983_v11 = vpop.f32.mrf.mxu2 }
 0x2fe   : > { %v991_v9 = vadd.f32 %v983_v11, %v942_v13 }
 0x305   : > { %v986_v25 = vpop.f32.mrf.mxu2 }
 0x306   : > { %v992_v61 = vadd.f32 %v986_v25, %v943_v24 }
 0x308   : > { %v994_v34 = vmax.f32 %v991_v9, %v992_v61 }
 0x30a   : > { %1001 = vrot.lane.b32.xlu0 %v994_v34, %s1335_s15 }
 0x36c   : > { %v997_v19 = vpop.permute.xlu0 %996 }
 0x36d   : > { %v999_v20 = vmax.f32 %v993_v1, %v997_v19 }
 0x36f   : > { %1295 = vmatmul.msk.f32.vlgmr.msrb.gmra.mxu2 %vm1030_vm8, %v999_v20 }
 0x37c   : > { %v1002_v21 = vpop.permute.xlu0 %1001 }
 0x37d   : > { %v1004_v22 = vmax.f32 %v994_v34, %v1002_v21 }
 0x37f   : > { %1294 = vmatmul.msk.f32.vlgmr.msrb.gmra.mxu3 %vm1030_vm8, %v1004_v22 }
 0x3f2   : > { %v1074_v31 = vpop.f32.mrf.mxu2 }
 0x402   : > { %v1051_v28 = vpop.f32.mrf.mxu3 }
 0x403   : > { %v1075_v32 = vadd.f32 %v1074_v31, %v1051_v28 }
 0x405   : > { %v1078_v49 = vadd.f32 %v1077_v27, %v1075_v32 }
 0x407   : > { %v1095_v37 = vmul.f32 %v1078_v49, %v1078_v49  ;;  %v1080_v38 = vsel %vm1079_vm9, %v1078_v49, 0.0 }
 0x408   : > { %v1081_v33 = vrot.slane %v1080_v38, 4 }
 0x409   : > { %v1096_v57 = vsel %vm1079_vm9, %v1095_v37, 0.0 }
 0x40a   : > { %v1082_v3 = vadd.f32 %v1081_v33, %v1080_v38  ;;  %v1097_v39 = vrot.slane %v1096_v57, 4 }
 0x40c   : > { %v1083_v40 = vrot.slane %v1082_v3, 2  ;;  %v1098_v41 = vadd.f32 %v1097_v39, %v1096_v57 }
 0x40e   : > { %v1084_v45 = vadd.f32 %v1083_v40, %v1082_v3  ;;  %v1099_v43 = vrot.slane %v1098_v41, 2 }
 0x410   : > { %v1085_v47 = vrot.slane %v1084_v45, 1  ;;  %v1100_v48 = vadd.f32 %v1099_v43, %v1098_v41 }
 0x412   : > { %v1086_v52 = vadd.f32 %v1085_v47, %v1084_v45  ;;  %v1101_v53 = vrot.slane %v1100_v48, 1 }
 0x414   : > { %v1094_v54 = vmul.f32 %v1093_v51, %v1086_v52  ;;  %v1102_v59 = vadd.f32 %v1101_v53, %v1100_v48 }
 0x416   : > { %v1103_v60 = vmul.f32 %v1102_v59, %v1093_v51  ;;  %v1104_v63 = vmul.f32 %v1094_v54, %v1094_v54  ;;  %v1107_v50 = vsub.f32 %v1078_v49, %v1094_v54 }
 0x418   : > { %v1105_v2 = vsub.f32 %v1103_v60, %v1104_v63 }
 0x41a   : > { %v1106_v10 = vmax.f32 %v1105_v2, 0.0 }
 0x41c   : > { %v1108_v4 = vadd.f32 1e-05, %v1106_v10 }
 0x41e   : > { %1320 = vrsqrt.f32 %v1108_v4  ;;  %vm1115_vm12 = vweird.f32 %v1108_v4 }
 0x424   : > { %v1321_v44 = vpop.eup %1320 }
 0x425   : > { %v1110_v0 = vmul.f32 %v1321_v44, %v1108_v4  ;;  %vm1116_vm11 = vweird.f32 %v1321_v44 }
 0x426   : > { %vm1117_vm13 = vmor %vm1115_vm12, %vm1116_vm11 }
 0x427   : > { %v1111_v46 = vmul.f32 %v1321_v44, %v1110_v0 }
 0x429   : > { %v1112_v1 = vmul.f32 0.5, %v1111_v46 }
 0x42b   : > { %v1113_v5 = vsub.f32 1.5, %v1112_v1 }
 0x42d   : > { %v1114_v6 = vmul.f32 %v1321_v44, %v1113_v5 }
 0x42f   : > { %v1118_v11 = vsel %vm1117_vm13, %v1321_v44, %v1114_v6 }
 0x430   : > { %v1119_v16 = vmul.f32 %v1118_v11, %v1107_v50 }
 0x432   : > { %v1121_v17 = vmul.f32 %v1120_v58, %v1119_v16 }
 0x434   : > { %v1123_v13 = vadd.f32 %v1122_v12, %v1121_v17 }
 0x436   : > { %v1124_v24 = vsel %vm1079_vm9, %v1123_v13, -inf }
 0x437   : > { %1125 = vmax.xlane.f32.xlu1 %v1124_v24 }
 0x4aa   : > { %v1126_v25 = vpop.xlane.xlu1 %1125 }
 0x4ab   : > { %v1127_v9 = vsub.f32 %v1123_v13, %v1126_v25 }
 0x4ad   : > { %v1128_v61 = vmul.f32 1.442695, %v1127_v9 }
 0x4af   : > { %1322 = vpow2.f32 %v1128_v61 }
 0x4b5   : > { %v1323_v34 = vpop.eup %1322 }
 0x4b6   : > { %v1130_v56 = vsel %vm1079_vm9, %v1323_v34, 0.0 }
 0x4b7   : > { %1131 = vadd.xlane.f32.xlu1 %v1130_v56 }
 0x52a   : > { %v1132_v14 = vpop.xlane.xlu1 %1131 }
 0x52b   : > { %1324 = vrcp.f32 %v1132_v14  ;;  %v1144_v7 = vand.u32 2147483648, %v1132_v14  ;;  %v1142_v18 = vand.u32 2147483647, %v1132_v14  ;;  %vm1138_vm15 = vweird.f32 %v1132_v14 }
 0x52d   : > { %v1145_v20 = vor.u32 1.1754944e-38, %v1144_v7  ;;  %vm1143_vm1 = vcmp.eq.f32.partialorder %v1142_v18, 8.507059e+37 }
 0x531   : > { %v1325_v35 = vpop.eup %1324 }
 0x532   : > { %v1134_v15 = vmul.f32 %v1325_v35, %v1132_v14  ;;  %vm1139_vm14 = vweird.f32 %v1325_v35 }
 0x533   : > { %vm1140_vm0 = vmor %vm1138_vm15, %vm1139_vm14 }
 0x534   : > { %v1135_v8 = vsub.f32 1.0, %v1134_v15 }
 0x536   : > { %v1136_v62 = vmul.f32 %v1325_v35, %v1135_v8 }
 0x538   : > { %v1137_v19 = vadd.f32 %v1325_v35, %v1136_v62 }
 0x53a   : > { %v1141_v21 = vsel %vm1140_vm0, %v1325_v35, %v1137_v19 }
 0x53b   : > { %v1146_v22 = vsel %vm1143_vm1, %v1145_v20, %v1141_v21 }
 0x53c   : > { %v1147_v23 = vmul.f32 %v1323_v34, %v1146_v22 }
 0x53e   : > { %1148 = vst.msk [vmem:[%s302_s21] sm:$0xff] %vm1079_vm9, %v1147_v23 }
 0x53f PF: > { %s15_s18 = sadd.s32 1, %s1332_s18  }
 0x540   : > { %p12_p4 = scmp.ge.s32.totalorder %s15_s18, 4  }
 0x542   :  { %14 = sbr.rel (!%p12_p4) target bundleno = 1 (0x1), region = 86 }

</bundles_post_ra>
